<compile_context>
chip_gen: v7x
topology: tpu7x:2x2x1
jax: 0.10.0
libtpu: 0.0.40
codegen_flags: <defaults>
</compile_context>

<pallas_src>
import numpy as np
import jax
import jax.numpy as jnp
from jax.experimental import pallas as pl
from jax.experimental.pallas import tpu as pltpu


# ----------------------------------------------------------------------------
# Deterministic filter construction (mirrors CannyEdge.__init__).
# ----------------------------------------------------------------------------
def _gaussian_window(n, std):
    # scipy.signal.windows.gaussian(n, std)
    i = np.arange(n) - (n - 1) / 2.0
    return np.exp(-0.5 * (i / std) ** 2)


_g = _gaussian_window(5, 1.0)
_g = _g / _g.sum()
GAUSS = tuple(float(v) for v in _g)                  # normalized 5-tap blur

# directional_filter channel d computes gm[h, w] - gm[h + dh, w + dw]
DIR_OFFSETS = ((0, 1), (1, 1), (1, 0), (1, -1),
               (0, -1), (-1, -1), (-1, 0), (-1, 1))

# 45-degree sector boundaries.  The module uses the constant 3.14159 (not pi),
# so the boundaries are tan(k * 3.14159/8); only pixels within ~3e-6 rad of a
# boundary can differ from the torch reference (acknowledged tolerance).
_T1 = float(np.tan(0.5 * 3.14159 / 4.0))             # ~tan(22.5 deg)
_T2 = float(np.tan(1.5 * 3.14159 / 4.0))             # ~tan(67.5 deg)

HALO = 8      # context rows DMA'd above/below each row block (>= 4 required)
PAD = 8       # zero guard rows around the stacked scratch slabs


def _round_up(x, m):
    return ((x + m - 1) // m) * m


def _band_matrix(w_pad, w, taps):
    """[w_pad, w_pad] matrix B so that (row @ B) == 'same' cross-correlation of
    the row with `taps`, zero padded at the *true* width `w` (both input
    columns >= w and output columns >= w are masked out)."""
    r = len(taps) // 2
    band = np.zeros((w_pad, w_pad), np.float32)
    for t, v in enumerate(taps):
        if v == 0.0:
            continue
        off = t - r
        for col in range(w):
            j = col + off
            if 0 <= j < w:
                band[j, col] = float(v)
    return jnp.asarray(band)


# ----------------------------------------------------------------------------
# Kernel factory.
# ----------------------------------------------------------------------------
def _make_kernel(H, W, W_pad, TH, R, threshold):
    has_thr = (threshold != 0.0)
    n_out = 6 if has_thr else 4
    three_r = 3 * R

    def shift_w(x, dw, col_iota):
        """y[:, w] = x[:, w + dw], zero where w + dw falls outside [0, W)."""
        y = pltpu.roll(x, shift=(-dw) % W_pad, axis=1)
        if dw > 0:
            return jnp.where(col_iota < (W - dw), y, 0.0)
        return jnp.where(col_iota >= (-dw), y, 0.0)

    def kernel(img_hbm, bandg_ref, *rest):
        outs = rest[:n_out]
        in_scr, bc_scr, gm3_scr, dma_sem = rest[n_out:]
        blur_ref, gmag_ref, gori_ref, thin_ref = outs[0], outs[1], outs[2], outs[3]

        i = pl.program_id(0)
        row0 = i * TH                                # first padded-input row of this block

        # Zero guard strips so off-by-|t| vertical reads near the slab ends are
        # deterministic (they are never consumed by valid output rows anyway).
        zpad = jnp.zeros((PAD, W_pad), jnp.float32)
        in_scr[pl.ds(0, PAD), :] = zpad
        in_scr[pl.ds(PAD + three_r, PAD), :] = zpad
        bc_scr[pl.ds(0, PAD), :] = zpad
        bc_scr[pl.ds(PAD + three_r, PAD), :] = zpad

        # ---- manual DMA of the halo-extended row block, one copy per channel,
        #      into one channel-stacked slab (3 slabs of R rows).
        # TODO(synk): double-buffer / prefetch the next block's rows; kept
        # blocking so correctness is independent of megacore iteration order.
        copies = []
        for c in range(3):
            cp = pltpu.make_async_copy(
                img_hbm.at[c, pl.ds(row0, R), :],
                in_scr.at[pl.ds(PAD + c * R, R), :],
                dma_sem.at[c])
            cp.start()
            copies.append(cp)

        # ---- hoisted index vectors / masks (built once per block)
        row_iota = jax.lax.broadcasted_iota(jnp.int32, (R, W_pad), 0)
        g_row = row_iota + (row0 - HALO)             # global image row of slab row
        rowmask = jnp.logical_and(g_row >= 0, g_row < H)
        col_iota = jax.lax.broadcasted_iota(jnp.int32, (R, W_pad), 1)
        col_iota3 = jax.lax.broadcasted_iota(jnp.int32, (three_r, W_pad), 1)

        for cp in copies:
            cp.wait()

        # ---- Gaussian blur: vertical 5 taps = sublane-offset reads of the
        #      stacked input slab, horizontal 5 taps = one banded MXU matmul.
        g0, g1, g2, g3, g4 = GAUSS
        xv = (g0 * in_scr[pl.ds(PAD - 2, three_r), :]
              + g1 * in_scr[pl.ds(PAD - 1, three_r), :]
              + g2 * in_scr[pl.ds(PAD, three_r), :]
              + g3 * in_scr[pl.ds(PAD + 1, three_r), :]
              + g4 * in_scr[pl.ds(PAD + 2, three_r), :])
        bc = jnp.dot(xv, bandg_ref[...],
                     preferred_element_type=jnp.float32,
                     precision=jax.lax.Precision.HIGHEST)

        # Zero the blurred image outside the true [0, H) rows (== the zero
        # padding the downstream Conv2d would see) and stash it so the vertical
        # Sobel taps become plain sublane-offset reads.
        for c in range(3):
            bc_c = jnp.where(rowmask, bc[c * R:(c + 1) * R], 0.0)
            bc_scr[pl.ds(PAD + c * R, R), :] = bc_c
            blur_ref[0, c] = bc_c[HALO:HALO + TH]

        # ---- Sobel (separable; the 3 vertical reads are shared by gx and gy)
        bcm1 = bc_scr[pl.ds(PAD - 1, three_r), :]
        bc0 = bc_scr[pl.ds(PAD, three_r), :]
        bcp1 = bc_scr[pl.ds(PAD + 1, three_r), :]
        vs8 = (bcm1 + 2.0 * bc0 + bcp1) * 0.125      # vertical [1,2,1]/8
        vd = bcm1 - bcp1                             # vertical [1,0,-1]
        gx = shift_w(vs8, -1, col_iota3) - shift_w(vs8, 1, col_iota3)
        gy = (shift_w(vd, -1, col_iota3) + 2.0 * vd
              + shift_w(vd, 1, col_iota3)) * 0.125

        gx0, gx1, gx2 = gx[:R], gx[R:2 * R], gx[2 * R:]
        gy0, gy1, gy2 = gy[:R], gy[R:2 * R], gy[2 * R:]
        gxs = gx0 + gx1 + gx2
        gys = gy0 + gy1 + gy2
        gmag = (jnp.sqrt(gx0 * gx0 + gy0 * gy0)
                + jnp.sqrt(gx1 * gx1 + gy1 * gy1)
                + jnp.sqrt(gx2 * gx2 + gy2 * gy2))
        gm = jnp.where(rowmask, gmag, 0.0)           # zero pad outside the image

        # The 3 lane-variants of grad_mag; the vertical +-1 neighbor offsets of
        # the directional filter then become free sublane-offset reads.
        gm3_scr[0] = gm
        gm3_scr[1] = shift_w(gm, 1, col_iota)        # value at (h, w+1)
        gm3_scr[2] = shift_w(gm, -1, col_iota)       # value at (h, w-1)

        # ---- orientation: direct 45-degree sector classification (no atan2,
        #      no divides): grad_ori = k * 45 with k in {0..8}.
        gx_o = gxs[HALO:HALO + TH]
        gy_o = gys[HALO:HALO + TH]
        gm_o = gm[HALO:HALO + TH]
        ax = jnp.abs(gx_o)
        ay = jnp.abs(gy_o)
        horiz = ay <= _T1 * ax
        vert = ay > _T2 * ax
        xnn = gx_o >= 0.0
        ynn = gy_o >= 0.0
        k = jnp.where(
            horiz,
            jnp.where(xnn, 4.0, jnp.where(ynn, 8.0, 0.0)),
            jnp.where(
                vert,
                jnp.where(ynn, 6.0, 2.0),
                jnp.where(xnn,
                          jnp.where(ynn, 5.0, 3.0),
                          jnp.where(ynn, 7.0, 1.0))))
        grad_ori = k * 45.0
        ipos = jnp.where(k == 8.0, 0.0, k)           # (ori/45) % 8
        ineg = jnp.where(k >= 4.0, k - 4.0, k + 4.0)  # (ori/45 + 4) % 8

        # ---- non-max suppression: pick the +/- direction neighbor with one
        #      8-way select each, then 2 subtractions.
        nbp = jnp.zeros((TH, W_pad), jnp.float32)
        nbn = jnp.zeros((TH, W_pad), jnp.float32)
        for d, (dh, dw) in enumerate(DIR_OFFSETS):
            jv = 0 if dw == 0 else (1 if dw == 1 else 2)
            nb = gm3_scr[jv, pl.ds(HALO + dh, TH), :]
            nbp = jnp.where(ipos == float(d), nb, nbp)
            nbn = jnp.where(ineg == float(d), nb, nbn)
        is_max = jnp.minimum(gm_o - nbp, gm_o - nbn) > 0.0
        thin = jnp.where(is_max, gm_o, 0.0)

        gmag_ref[0, 0] = gm_o
        gori_ref[0, 0] = grad_ori
        thin_ref[0, 0] = thin
        if has_thr:
            thr_ref, early_ref = outs[4], outs[5]
            thr_ref[0, 0] = jnp.where(thin < threshold, 0.0, thin)
            early_ref[0, 0] = jnp.where(gm_o < threshold, 0.0, gm_o)

    return kernel


# ----------------------------------------------------------------------------
# Wrapper.
# ----------------------------------------------------------------------------
def canny_edge(img, threshold=0.0, block_rows=128):
    """img: [1, 3, H, W] float32 in [-1, 1].  Returns the 6 outputs of the
    PyTorch module: (blurred_img, grad_mag, grad_orientation, thin_edges,
    thresholded, early_threshold)."""
    B, C, H, W = img.shape
    assert B == 1 and C == 3, "reference gather logic requires N=1, C=3"

    TH = min(_round_up(block_rows, 8), _round_up(H, 8))   # rows per grid block
    n_blocks = (H + TH - 1) // TH
    Hp = n_blocks * TH
    W_pad = _round_up(W, 128)                             # lane-dense last dim
    R = TH + 2 * HALO                                     # per-channel slab rows

    # Normalize *before* padding (fuses with the pad) so the zero halo equals
    # Conv2d's zero padding of the normalized image; pad rows for the block
    # halo and lanes to a multiple of 128.
    x = (img[0].astype(jnp.float32) + 1.0) * 0.5
    x = jnp.pad(x, ((0, 0), (HALO, Hp - H + HALO), (0, W_pad - W)))

    band_g = _band_matrix(W_pad, W, GAUSS)                # horizontal Gaussian on MXU

    has_thr = (threshold != 0.0)

    def ospec(c):
        return pl.BlockSpec((1, c, TH, W_pad), lambda i: (0, 0, i, 0))

    out_shape = [jax.ShapeDtypeStruct((1, 3, Hp, W_pad), jnp.float32),   # blurred
                 jax.ShapeDtypeStruct((1, 1, Hp, W_pad), jnp.float32),   # grad_mag
                 jax.ShapeDtypeStruct((1, 1, Hp, W_pad), jnp.float32),   # grad_orientation
                 jax.ShapeDtypeStruct((1, 1, Hp, W_pad), jnp.float32)]   # thin_edges
    out_specs = [ospec(3), ospec(1), ospec(1), ospec(1)]
    if has_thr:
        out_shape += [jax.ShapeDtypeStruct((1, 1, Hp, W_pad), jnp.float32),
                      jax.ShapeDtypeStruct((1, 1, Hp, W_pad), jnp.float32)]
        out_specs += [ospec(1), ospec(1)]

    kernel = _make_kernel(H, W, W_pad, TH, R, threshold)

    grid_spec = pltpu.PrefetchScalarGridSpec(
        num_scalar_prefetch=0,
        grid=(n_blocks,),
        in_specs=[
            pl.BlockSpec(memory_space=pl.ANY),               # padded image, raw HBM
            pl.BlockSpec((W_pad, W_pad), lambda i: (0, 0)),  # Gaussian band matrix
        ],
        out_specs=tuple(out_specs),
        scratch_shapes=[
            pltpu.VMEM((3 * R + 2 * PAD, W_pad), jnp.float32),  # stacked input slab
            pltpu.VMEM((3 * R + 2 * PAD, W_pad), jnp.float32),  # stacked blurred slab
            pltpu.VMEM((3, R, W_pad), jnp.float32),             # grad_mag + lane shifts
            pltpu.SemaphoreType.DMA((3,)),
        ],
    )

    res = pl.pallas_call(
        kernel,
        out_shape=tuple(out_shape),
        grid_spec=grid_spec,
        compiler_params=pltpu.CompilerParams(
            dimension_semantics=("parallel",),
            vmem_limit_bytes=48 * 1024 * 1024),
    )(x, band_g)

    def crop(a):
        return a[:, :, :H, :W]

    blur, gmag, gori, thin = crop(res[0]), crop(res[1]), crop(res[2]), crop(res[3])
    if has_thr:
        thr, early = crop(res[4]), crop(res[5])
    else:
        # threshold == 0: thresholded == thin_edges and early_threshold ==
        # grad_mag exactly (both are non-negative), so alias instead of doing
        # two more full-image HBM writes.
        thr, early = thin, gmag
    return blur, gmag, gori, thin, thr, early


if __name__ == "__main__":
    key = jax.random.PRNGKey(0)
    img = jax.random.uniform(key, (1, 3, 16, 16), dtype=jnp.float32,
                             minval=-1.0, maxval=1.0)
    outs = canny_edge(img)
    jax.block_until_ready(outs)
    print("KERNEL_OK")
</pallas_src>

<mosaic_0001>
module attributes {stable_mosaic.version = 11 : i64} {
  func.func @kernel(%arg0: i32, %arg1: memref<3x32x128xf32, #tpu.memory_space<any>>, %arg2: memref<128x128xf32, #tpu.memory_space<vmem>>, %arg3: memref<1x3x16x128xf32, #tpu.memory_space<vmem>>, %arg4: memref<1x1x16x128xf32, #tpu.memory_space<vmem>>, %arg5: memref<1x1x16x128xf32, #tpu.memory_space<vmem>>, %arg6: memref<1x1x16x128xf32, #tpu.memory_space<vmem>>, %arg7: memref<112x128xf32, #tpu.memory_space<vmem>>, %arg8: memref<112x128xf32, #tpu.memory_space<vmem>>, %arg9: memref<3x32x128xf32, #tpu.memory_space<vmem>>, %arg10: memref<3x!tpu.dma_semaphore, #tpu.memory_space<semaphore_mem>>) attributes {dimension_semantics = [#tpu.dimension_semantics<parallel>], iteration_bounds = array<i64: 1>, scalar_prefetch = 0 : i64, scratch_operands = 4 : i64, tpu.core_type = #tpu.core_type<tc>, window_params = [{}, {pipeline_mode = #tpu.pipeline_mode<synchronous>, transform_indices = @transform_1, window_bounds = array<i64: 128, 128>}, {transform_indices = @transform_2, window_bounds = array<i64: 1, 3, 16, 128>}, {transform_indices = @transform_3, window_bounds = array<i64: 1, 1, 16, 128>}, {transform_indices = @transform_4, window_bounds = array<i64: 1, 1, 16, 128>}, {transform_indices = @transform_5, window_bounds = array<i64: 1, 1, 16, 128>}]} {
    %c16_i32 = arith.constant 16 : i32
    %0 = arith.muli %arg0, %c16_i32 : i32
    %cst = arith.constant 0.000000e+00 : f32
    %1 = vector.broadcast %cst : f32 to vector<8x128xf32>
    %c0 = arith.constant 0 : index
    %c0_0 = arith.constant 0 : index
    %2 = vector.load %arg7[%c0, %c0_0] : memref<112x128xf32, #tpu.memory_space<vmem>>, vector<8x128xf32>
    tpu.vector_store %arg7[%c0, %c0_0], %1 {strides = array<i32>} : memref<112x128xf32, #tpu.memory_space<vmem>>, vector<8x128xf32>,
    %c104 = arith.constant 104 : index
    %c0_1 = arith.constant 0 : index
    %3 = vector.load %arg7[%c104, %c0_1] : memref<112x128xf32, #tpu.memory_space<vmem>>, vector<8x128xf32>
    tpu.vector_store %arg7[%c104, %c0_1], %1 {strides = array<i32>} : memref<112x128xf32, #tpu.memory_space<vmem>>, vector<8x128xf32>,
    %c0_2 = arith.constant 0 : index
    %c0_3 = arith.constant 0 : index
    %4 = vector.load %arg8[%c0_2, %c0_3] : memref<112x128xf32, #tpu.memory_space<vmem>>, vector<8x128xf32>
    tpu.vector_store %arg8[%c0_2, %c0_3], %1 {strides = array<i32>} : memref<112x128xf32, #tpu.memory_space<vmem>>, vector<8x128xf32>,
    %c104_4 = arith.constant 104 : index
    %c0_5 = arith.constant 0 : index
    %5 = vector.load %arg8[%c104_4, %c0_5] : memref<112x128xf32, #tpu.memory_space<vmem>>, vector<8x128xf32>
    tpu.vector_store %arg8[%c104_4, %c0_5], %1 {strides = array<i32>} : memref<112x128xf32, #tpu.memory_space<vmem>>, vector<8x128xf32>,
    %c0_i32 = arith.constant 0 : i32
    %c0_i32_6 = arith.constant 0 : i32
    %c0_i32_7 = arith.constant 0 : i32
    %6 = tpu.memref_slice %arg1[%c0_i32, %0, %c0_i32_7] : memref<3x32x128xf32, #tpu.memory_space<any>> -> memref<1x32x128xf32, #tpu.memory_space<any>>
    %7 = tpu.memref_squeeze %6 : memref<1x32x128xf32, #tpu.memory_space<any>> -> memref<32x128xf32, #tpu.memory_space<any>>
    %c8_i32 = arith.constant 8 : i32
    %c0_i32_8 = arith.constant 0 : i32
    %8 = tpu.memref_slice %arg7[%c8_i32, %c0_i32_8] : memref<112x128xf32, #tpu.memory_space<vmem>> -> memref<32x128xf32, #tpu.memory_space<vmem>>
    %9 = tpu.memref_slice %arg10[%c0_i32_6] : memref<3x!tpu.dma_semaphore, #tpu.memory_space<semaphore_mem>> -> memref<1x!tpu.dma_semaphore, #tpu.memory_space<semaphore_mem>>
    %10 = tpu.memref_squeeze %9 : memref<1x!tpu.dma_semaphore, #tpu.memory_space<semaphore_mem>> -> memref<!tpu.dma_semaphore, #tpu.memory_space<semaphore_mem>>
    tpu.enqueue_dma source(%7 : memref<32x128xf32, #tpu.memory_space<any>>) target(%8 : memref<32x128xf32, #tpu.memory_space<vmem>>) target_semaphore(%10 : memref<!tpu.dma_semaphore, #tpu.memory_space<semaphore_mem>>)
    %c1_i32 = arith.constant 1 : i32
    %c1_i32_9 = arith.constant 1 : i32
    %c0_i32_10 = arith.constant 0 : i32
    %11 = tpu.memref_slice %arg1[%c1_i32, %0, %c0_i32_10] : memref<3x32x128xf32, #tpu.memory_space<any>> -> memref<1x32x128xf32, #tpu.memory_space<any>>
    %12 = tpu.memref_squeeze %11 : memref<1x32x128xf32, #tpu.memory_space<any>> -> memref<32x128xf32, #tpu.memory_space<any>>
    %c40_i32 = arith.constant 40 : i32
    %c0_i32_11 = arith.constant 0 : i32
    %13 = tpu.memref_slice %arg7[%c40_i32, %c0_i32_11] : memref<112x128xf32, #tpu.memory_space<vmem>> -> memref<32x128xf32, #tpu.memory_space<vmem>>
    %14 = tpu.memref_slice %arg10[%c1_i32_9] : memref<3x!tpu.dma_semaphore, #tpu.memory_space<semaphore_mem>> -> memref<1x!tpu.dma_semaphore, #tpu.memory_space<semaphore_mem>>
    %15 = tpu.memref_squeeze %14 : memref<1x!tpu.dma_semaphore, #tpu.memory_space<semaphore_mem>> -> memref<!tpu.dma_semaphore, #tpu.memory_space<semaphore_mem>>
    tpu.enqueue_dma source(%12 : memref<32x128xf32, #tpu.memory_space<any>>) target(%13 : memref<32x128xf32, #tpu.memory_space<vmem>>) target_semaphore(%15 : memref<!tpu.dma_semaphore, #tpu.memory_space<semaphore_mem>>)
    %c2_i32 = arith.constant 2 : i32
    %c2_i32_12 = arith.constant 2 : i32
    %c0_i32_13 = arith.constant 0 : i32
    %16 = tpu.memref_slice %arg1[%c2_i32, %0, %c0_i32_13] : memref<3x32x128xf32, #tpu.memory_space<any>> -> memref<1x32x128xf32, #tpu.memory_space<any>>
    %17 = tpu.memref_squeeze %16 : memref<1x32x128xf32, #tpu.memory_space<any>> -> memref<32x128xf32, #tpu.memory_space<any>>
    %c72_i32 = arith.constant 72 : i32
    %c0_i32_14 = arith.constant 0 : i32
    %18 = tpu.memref_slice %arg7[%c72_i32, %c0_i32_14] : memref<112x128xf32, #tpu.memory_space<vmem>> -> memref<32x128xf32, #tpu.memory_space<vmem>>
    %19 = tpu.memref_slice %arg10[%c2_i32_12] : memref<3x!tpu.dma_semaphore, #tpu.memory_space<semaphore_mem>> -> memref<1x!tpu.dma_semaphore, #tpu.memory_space<semaphore_mem>>
    %20 = tpu.memref_squeeze %19 : memref<1x!tpu.dma_semaphore, #tpu.memory_space<semaphore_mem>> -> memref<!tpu.dma_semaphore, #tpu.memory_space<semaphore_mem>>
    tpu.enqueue_dma source(%17 : memref<32x128xf32, #tpu.memory_space<any>>) target(%18 : memref<32x128xf32, #tpu.memory_space<vmem>>) target_semaphore(%20 : memref<!tpu.dma_semaphore, #tpu.memory_space<semaphore_mem>>)
    %21 = tpu.iota {dimensions = array<i32: 0>} : vector<32x128xi32>
    %c8_i32_15 = arith.constant 8 : i32
    %22 = arith.subi %0, %c8_i32_15 : i32
    %23 = vector.broadcast %22 : i32 to vector<32x128xi32>
    %24 = arith.addi %21, %23 : vector<32x128xi32>
    %c0_i32_16 = arith.constant 0 : i32
    %25 = vector.broadcast %c0_i32_16 : i32 to vector<32x128xi32>
    %26 = arith.cmpi sge, %24, %25 : vector<32x128xi32>
    %c16_i32_17 = arith.constant 16 : i32
    %27 = vector.broadcast %c16_i32_17 : i32 to vector<32x128xi32>
    %28 = arith.cmpi slt, %24, %27 : vector<32x128xi32>
    %29 = arith.andi %26, %28 : vector<32x128xi1>
    %30 = tpu.iota {dimensions = array<i32: 1>} : vector<32x128xi32>
    %31 = tpu.iota {dimensions = array<i32: 1>} : vector<96x128xi32>
    %c0_i32_18 = arith.constant 0 : i32
    %c0_i32_19 = arith.constant 0 : i32
    %c0_i32_20 = arith.constant 0 : i32
    %32 = tpu.memref_slice %arg1[%c0_i32_18, %0, %c0_i32_20] : memref<3x32x128xf32, #tpu.memory_space<any>> -> memref<1x32x128xf32, #tpu.memory_space<any>>
    %33 = tpu.memref_squeeze %32 : memref<1x32x128xf32, #tpu.memory_space<any>> -> memref<32x128xf32, #tpu.memory_space<any>>
    %c8_i32_21 = arith.constant 8 : i32
    %c0_i32_22 = arith.constant 0 : i32
    %34 = tpu.memref_slice %arg7[%c8_i32_21, %c0_i32_22] : memref<112x128xf32, #tpu.memory_space<vmem>> -> memref<32x128xf32, #tpu.memory_space<vmem>>
    %35 = tpu.memref_slice %arg10[%c0_i32_19] : memref<3x!tpu.dma_semaphore, #tpu.memory_space<semaphore_mem>> -> memref<1x!tpu.dma_semaphore, #tpu.memory_space<semaphore_mem>>
    %36 = tpu.memref_squeeze %35 : memref<1x!tpu.dma_semaphore, #tpu.memory_space<semaphore_mem>> -> memref<!tpu.dma_semaphore, #tpu.memory_space<semaphore_mem>>
    tpu.wait_dma2 semaphore(%36 : memref<!tpu.dma_semaphore, #tpu.memory_space<semaphore_mem>>) src(%33 : memref<32x128xf32, #tpu.memory_space<any>>) dst(%34 : memref<32x128xf32, #tpu.memory_space<vmem>>)
    %c1_i32_23 = arith.constant 1 : i32
    %c1_i32_24 = arith.constant 1 : i32
    %c0_i32_25 = arith.constant 0 : i32
    %37 = tpu.memref_slice %arg1[%c1_i32_23, %0, %c0_i32_25] : memref<3x32x128xf32, #tpu.memory_space<any>> -> memref<1x32x128xf32, #tpu.memory_space<any>>
    %38 = tpu.memref_squeeze %37 : memref<1x32x128xf32, #tpu.memory_space<any>> -> memref<32x128xf32, #tpu.memory_space<any>>
    %c40_i32_26 = arith.constant 40 : i32
    %c0_i32_27 = arith.constant 0 : i32
    %39 = tpu.memref_slice %arg7[%c40_i32_26, %c0_i32_27] : memref<112x128xf32, #tpu.memory_space<vmem>> -> memref<32x128xf32, #tpu.memory_space<vmem>>
    %40 = tpu.memref_slice %arg10[%c1_i32_24] : memref<3x!tpu.dma_semaphore, #tpu.memory_space<semaphore_mem>> -> memref<1x!tpu.dma_semaphore, #tpu.memory_space<semaphore_mem>>
    %41 = tpu.memref_squeeze %40 : memref<1x!tpu.dma_semaphore, #tpu.memory_space<semaphore_mem>> -> memref<!tpu.dma_semaphore, #tpu.memory_space<semaphore_mem>>
    tpu.wait_dma2 semaphore(%41 : memref<!tpu.dma_semaphore, #tpu.memory_space<semaphore_mem>>) src(%38 : memref<32x128xf32, #tpu.memory_space<any>>) dst(%39 : memref<32x128xf32, #tpu.memory_space<vmem>>)
    %c2_i32_28 = arith.constant 2 : i32
    %c2_i32_29 = arith.constant 2 : i32
    %c0_i32_30 = arith.constant 0 : i32
    %42 = tpu.memref_slice %arg1[%c2_i32_28, %0, %c0_i32_30] : memref<3x32x128xf32, #tpu.memory_space<any>> -> memref<1x32x128xf32, #tpu.memory_space<any>>
    %43 = tpu.memref_squeeze %42 : memref<1x32x128xf32, #tpu.memory_space<any>> -> memref<32x128xf32, #tpu.memory_space<any>>
    %c72_i32_31 = arith.constant 72 : i32
    %c0_i32_32 = arith.constant 0 : i32
    %44 = tpu.memref_slice %arg7[%c72_i32_31, %c0_i32_32] : memref<112x128xf32, #tpu.memory_space<vmem>> -> memref<32x128xf32, #tpu.memory_space<vmem>>
    %45 = tpu.memref_slice %arg10[%c2_i32_29] : memref<3x!tpu.dma_semaphore, #tpu.memory_space<semaphore_mem>> -> memref<1x!tpu.dma_semaphore, #tpu.memory_space<semaphore_mem>>
    %46 = tpu.memref_squeeze %45 : memref<1x!tpu.dma_semaphore, #tpu.memory_space<semaphore_mem>> -> memref<!tpu.dma_semaphore, #tpu.memory_space<semaphore_mem>>
    tpu.wait_dma2 semaphore(%46 : memref<!tpu.dma_semaphore, #tpu.memory_space<semaphore_mem>>) src(%43 : memref<32x128xf32, #tpu.memory_space<any>>) dst(%44 : memref<32x128xf32, #tpu.memory_space<vmem>>)
    %c6 = arith.constant 6 : index
    %c0_33 = arith.constant 0 : index
    %47 = vector.load %arg7[%c6, %c0_33] : memref<112x128xf32, #tpu.memory_space<vmem>>, vector<96x128xf32>
    %cst_34 = arith.constant 0.054488685 : f32
    %48 = vector.broadcast %cst_34 : f32 to vector<96x128xf32>
    %49 = arith.mulf %48, %47 : vector<96x128xf32>
    %c7 = arith.constant 7 : index
    %c0_35 = arith.constant 0 : index
    %50 = vector.load %arg7[%c7, %c0_35] : memref<112x128xf32, #tpu.memory_space<vmem>>, vector<96x128xf32>
    %cst_36 = arith.constant 0.244201347 : f32
    %51 = vector.broadcast %cst_36 : f32 to vector<96x128xf32>
    %52 = arith.mulf %51, %50 : vector<96x128xf32>
    %53 = arith.addf %49, %52 : vector<96x128xf32>
    %c8 = arith.constant 8 : index
    %c0_37 = arith.constant 0 : index
    %54 = vector.load %arg7[%c8, %c0_37] : memref<112x128xf32, #tpu.memory_space<vmem>>, vector<96x128xf32>
    %cst_38 = arith.constant 0.402619958 : f32
    %55 = vector.broadcast %cst_38 : f32 to vector<96x128xf32>
    %56 = arith.mulf %55, %54 : vector<96x128xf32>
    %57 = arith.addf %53, %56 : vector<96x128xf32>
    %c9 = arith.constant 9 : index
    %c0_39 = arith.constant 0 : index
    %58 = vector.load %arg7[%c9, %c0_39] : memref<112x128xf32, #tpu.memory_space<vmem>>, vector<96x128xf32>
    %cst_40 = arith.constant 0.244201347 : f32
    %59 = vector.broadcast %cst_40 : f32 to vector<96x128xf32>
    %60 = arith.mulf %59, %58 : vector<96x128xf32>
    %61 = arith.addf %57, %60 : vector<96x128xf32>
    %c10 = arith.constant 10 : index
    %c0_41 = arith.constant 0 : index
    %62 = vector.load %arg7[%c10, %c0_41] : memref<112x128xf32, #tpu.memory_space<vmem>>, vector<96x128xf32>
    %cst_42 = arith.constant 0.054488685 : f32
    %63 = vector.broadcast %cst_42 : f32 to vector<96x128xf32>
    %64 = arith.mulf %63, %62 : vector<96x128xf32>
    %65 = arith.addf %61, %64 : vector<96x128xf32>
    %c0_43 = arith.constant 0 : index
    %c0_44 = arith.constant 0 : index
    %66 = vector.load %arg2[%c0_43, %c0_44] : memref<128x128xf32, #tpu.memory_space<vmem>>, vector<128x128xf32>
    %cst_45 = arith.constant dense<0.000000e+00> : vector<96x128xf32>
    %67 = tpu.matmul %65, %66, %cst_45 {dimension_numbers = #tpu.dot_dimension_numbers<[1], [0], [0], [1], [0, 0, 1, 1], [], []>, precision = #tpu.contract_precision<fp32>} : vector<96x128xf32>, vector<128x128xf32>, vector<96x128xf32> -> vector<96x128xf32>
    %68 = vector.extract_strided_slice %67 {offsets = [0, 0], sizes = [32, 128], strides = [1, 1]} : vector<96x128xf32> to vector<32x128xf32>
    %cst_46 = arith.constant 0.000000e+00 : f32
    %69 = vector.broadcast %cst_46 : f32 to vector<32x128xf32>
    %70 = arith.select %29, %68, %69 : vector<32x128xi1>, vector<32x128xf32>
    %c8_47 = arith.constant 8 : index
    %c0_48 = arith.constant 0 : index
    %71 = vector.load %arg8[%c8_47, %c0_48] : memref<112x128xf32, #tpu.memory_space<vmem>>, vector<32x128xf32>
    tpu.vector_store %arg8[%c8_47, %c0_48], %70 {strides = array<i32>} : memref<112x128xf32, #tpu.memory_space<vmem>>, vector<32x128xf32>,
    %72 = vector.extract_strided_slice %70 {offsets = [8, 0], sizes = [16, 128], strides = [1, 1]} : vector<32x128xf32> to vector<16x128xf32>
    %c0_49 = arith.constant 0 : index
    %c0_50 = arith.constant 0 : index
    %c0_51 = arith.constant 0 : index
    %c0_52 = arith.constant 0 : index
    %73 = vector.load %arg3[%c0_49, %c0_50, %c0_51, %c0_52] : memref<1x3x16x128xf32, #tpu.memory_space<vmem>>, vector<1x1x16x128xf32>
    %74 = vector.shape_cast %73 : vector<1x1x16x128xf32> to vector<16x128xf32>
    %75 = vector.shape_cast %72 : vector<16x128xf32> to vector<1x1x16x128xf32>
    tpu.vector_store %arg3[%c0_49, %c0_50, %c0_51, %c0_52], %75 {strides = array<i32>} : memref<1x3x16x128xf32, #tpu.memory_space<vmem>>, vector<1x1x16x128xf32>,
    %76 = vector.extract_strided_slice %67 {offsets = [32, 0], sizes = [32, 128], strides = [1, 1]} : vector<96x128xf32> to vector<32x128xf32>
    %cst_53 = arith.constant 0.000000e+00 : f32
    %77 = vector.broadcast %cst_53 : f32 to vector<32x128xf32>
    %78 = arith.select %29, %76, %77 : vector<32x128xi1>, vector<32x128xf32>
    %c40 = arith.constant 40 : index
    %c0_54 = arith.constant 0 : index
    %79 = vector.load %arg8[%c40, %c0_54] : memref<112x128xf32, #tpu.memory_space<vmem>>, vector<32x128xf32>
    tpu.vector_store %arg8[%c40, %c0_54], %78 {strides = array<i32>} : memref<112x128xf32, #tpu.memory_space<vmem>>, vector<32x128xf32>,
    %80 = vector.extract_strided_slice %78 {offsets = [8, 0], sizes = [16, 128], strides = [1, 1]} : vector<32x128xf32> to vector<16x128xf32>
    %c0_55 = arith.constant 0 : index
    %c1 = arith.constant 1 : index
    %c0_56 = arith.constant 0 : index
    %c0_57 = arith.constant 0 : index
    %81 = vector.load %arg3[%c0_55, %c1, %c0_56, %c0_57] : memref<1x3x16x128xf32, #tpu.memory_space<vmem>>, vector<1x1x16x128xf32>
    %82 = vector.shape_cast %81 : vector<1x1x16x128xf32> to vector<16x128xf32>
    %83 = vector.shape_cast %80 : vector<16x128xf32> to vector<1x1x16x128xf32>
    tpu.vector_store %arg3[%c0_55, %c1, %c0_56, %c0_57], %83 {strides = array<i32>} : memref<1x3x16x128xf32, #tpu.memory_space<vmem>>, vector<1x1x16x128xf32>,
    %84 = vector.extract_strided_slice %67 {offsets = [64, 0], sizes = [32, 128], strides = [1, 1]} : vector<96x128xf32> to vector<32x128xf32>
    %cst_58 = arith.constant 0.000000e+00 : f32
    %85 = vector.broadcast %cst_58 : f32 to vector<32x128xf32>
    %86 = arith.select %29, %84, %85 : vector<32x128xi1>, vector<32x128xf32>
    %c72 = arith.constant 72 : index
    %c0_59 = arith.constant 0 : index
    %87 = vector.load %arg8[%c72, %c0_59] : memref<112x128xf32, #tpu.memory_space<vmem>>, vector<32x128xf32>
    tpu.vector_store %arg8[%c72, %c0_59], %86 {strides = array<i32>} : memref<112x128xf32, #tpu.memory_space<vmem>>, vector<32x128xf32>,
    %88 = vector.extract_strided_slice %86 {offsets = [8, 0], sizes = [16, 128], strides = [1, 1]} : vector<32x128xf32> to vector<16x128xf32>
    %c0_60 = arith.constant 0 : index
    %c2 = arith.constant 2 : index
    %c0_61 = arith.constant 0 : index
    %c0_62 = arith.constant 0 : index
    %89 = vector.load %arg3[%c0_60, %c2, %c0_61, %c0_62] : memref<1x3x16x128xf32, #tpu.memory_space<vmem>>, vector<1x1x16x128xf32>
    %90 = vector.shape_cast %89 : vector<1x1x16x128xf32> to vector<16x128xf32>
    %91 = vector.shape_cast %88 : vector<16x128xf32> to vector<1x1x16x128xf32>
    tpu.vector_store %arg3[%c0_60, %c2, %c0_61, %c0_62], %91 {strides = array<i32>} : memref<1x3x16x128xf32, #tpu.memory_space<vmem>>, vector<1x1x16x128xf32>,
    %c7_63 = arith.constant 7 : index
    %c0_64 = arith.constant 0 : index
    %92 = vector.load %arg8[%c7_63, %c0_64] : memref<112x128xf32, #tpu.memory_space<vmem>>, vector<96x128xf32>
    %c8_65 = arith.constant 8 : index
    %c0_66 = arith.constant 0 : index
    %93 = vector.load %arg8[%c8_65, %c0_66] : memref<112x128xf32, #tpu.memory_space<vmem>>, vector<96x128xf32>
    %c9_67 = arith.constant 9 : index
    %c0_68 = arith.constant 0 : index
    %94 = vector.load %arg8[%c9_67, %c0_68] : memref<112x128xf32, #tpu.memory_space<vmem>>, vector<96x128xf32>
    %cst_69 = arith.constant 2.000000e+00 : f32
    %95 = vector.broadcast %cst_69 : f32 to vector<96x128xf32>
    %96 = arith.mulf %95, %93 : vector<96x128xf32>
    %97 = arith.addf %92, %96 : vector<96x128xf32>
    %98 = arith.addf %97, %94 : vector<96x128xf32>
    %cst_70 = arith.constant 1.250000e-01 : f32
    %99 = vector.broadcast %cst_70 : f32 to vector<96x128xf32>
    %100 = arith.mulf %98, %99 : vector<96x128xf32>
    %101 = arith.subf %92, %94 : vector<96x128xf32>
    %c1_i32_71 = arith.constant 1 : i32
    %102 = tpu.dynamic_rotate %100 by %c1_i32_71 dim 1 : vector<96x128xf32>, i32 -> vector<96x128xf32>
    %c1_i32_72 = arith.constant 1 : i32
    %103 = vector.broadcast %c1_i32_72 : i32 to vector<96x128xi32>
    %104 = arith.cmpi sge, %31, %103 : vector<96x128xi32>
    %cst_73 = arith.constant 0.000000e+00 : f32
    %105 = vector.broadcast %cst_73 : f32 to vector<96x128xf32>
    %106 = arith.select %104, %102, %105 : vector<96x128xi1>, vector<96x128xf32>
    %c127_i32 = arith.constant 127 : i32
    %107 = tpu.dynamic_rotate %100 by %c127_i32 dim 1 : vector<96x128xf32>, i32 -> vector<96x128xf32>
    %c15_i32 = arith.constant 15 : i32
    %108 = vector.broadcast %c15_i32 : i32 to vector<96x128xi32>
    %109 = arith.cmpi slt, %31, %108 : vector<96x128xi32>
    %cst_74 = arith.constant 0.000000e+00 : f32
    %110 = vector.broadcast %cst_74 : f32 to vector<96x128xf32>
    %111 = arith.select %109, %107, %110 : vector<96x128xi1>, vector<96x128xf32>
    %112 = arith.subf %106, %111 : vector<96x128xf32>
    %c1_i32_75 = arith.constant 1 : i32
    %113 = tpu.dynamic_rotate %101 by %c1_i32_75 dim 1 : vector<96x128xf32>, i32 -> vector<96x128xf32>
    %c1_i32_76 = arith.constant 1 : i32
    %114 = vector.broadcast %c1_i32_76 : i32 to vector<96x128xi32>
    %115 = arith.cmpi sge, %31, %114 : vector<96x128xi32>
    %cst_77 = arith.constant 0.000000e+00 : f32
    %116 = vector.broadcast %cst_77 : f32 to vector<96x128xf32>
    %117 = arith.select %115, %113, %116 : vector<96x128xi1>, vector<96x128xf32>
    %cst_78 = arith.constant 2.000000e+00 : f32
    %118 = vector.broadcast %cst_78 : f32 to vector<96x128xf32>
    %119 = arith.mulf %118, %101 : vector<96x128xf32>
    %120 = arith.addf %117, %119 : vector<96x128xf32>
    %c127_i32_79 = arith.constant 127 : i32
    %121 = tpu.dynamic_rotate %101 by %c127_i32_79 dim 1 : vector<96x128xf32>, i32 -> vector<96x128xf32>
    %c15_i32_80 = arith.constant 15 : i32
    %122 = vector.broadcast %c15_i32_80 : i32 to vector<96x128xi32>
    %123 = arith.cmpi slt, %31, %122 : vector<96x128xi32>
    %cst_81 = arith.constant 0.000000e+00 : f32
    %124 = vector.broadcast %cst_81 : f32 to vector<96x128xf32>
    %125 = arith.select %123, %121, %124 : vector<96x128xi1>, vector<96x128xf32>
    %126 = arith.addf %120, %125 : vector<96x128xf32>
    %cst_82 = arith.constant 1.250000e-01 : f32
    %127 = vector.broadcast %cst_82 : f32 to vector<96x128xf32>
    %128 = arith.mulf %126, %127 : vector<96x128xf32>
    %129 = vector.extract_strided_slice %112 {offsets = [0, 0], sizes = [32, 128], strides = [1, 1]} : vector<96x128xf32> to vector<32x128xf32>
    %130 = vector.extract_strided_slice %112 {offsets = [32, 0], sizes = [32, 128], strides = [1, 1]} : vector<96x128xf32> to vector<32x128xf32>
    %131 = vector.extract_strided_slice %112 {offsets = [64, 0], sizes = [32, 128], strides = [1, 1]} : vector<96x128xf32> to vector<32x128xf32>
    %132 = vector.extract_strided_slice %128 {offsets = [0, 0], sizes = [32, 128], strides = [1, 1]} : vector<96x128xf32> to vector<32x128xf32>
    %133 = vector.extract_strided_slice %128 {offsets = [32, 0], sizes = [32, 128], strides = [1, 1]} : vector<96x128xf32> to vector<32x128xf32>
    %134 = vector.extract_strided_slice %128 {offsets = [64, 0], sizes = [32, 128], strides = [1, 1]} : vector<96x128xf32> to vector<32x128xf32>
    %135 = arith.addf %129, %130 : vector<32x128xf32>
    %136 = arith.addf %135, %131 : vector<32x128xf32>
    %137 = arith.addf %132, %133 : vector<32x128xf32>
    %138 = arith.addf %137, %134 : vector<32x128xf32>
    %139 = arith.mulf %129, %129 : vector<32x128xf32>
    %140 = arith.mulf %132, %132 : vector<32x128xf32>
    %141 = arith.addf %139, %140 : vector<32x128xf32>
    %142 = math.sqrt %141 : vector<32x128xf32>
    %143 = arith.mulf %130, %130 : vector<32x128xf32>
    %144 = arith.mulf %133, %133 : vector<32x128xf32>
    %145 = arith.addf %143, %144 : vector<32x128xf32>
    %146 = math.sqrt %145 : vector<32x128xf32>
    %147 = arith.addf %142, %146 : vector<32x128xf32>
    %148 = arith.mulf %131, %131 : vector<32x128xf32>
    %149 = arith.mulf %134, %134 : vector<32x128xf32>
    %150 = arith.addf %148, %149 : vector<32x128xf32>
    %151 = math.sqrt %150 : vector<32x128xf32>
    %152 = arith.addf %147, %151 : vector<32x128xf32>
    %cst_83 = arith.constant 0.000000e+00 : f32
    %153 = vector.broadcast %cst_83 : f32 to vector<32x128xf32>
    %154 = arith.select %29, %152, %153 : vector<32x128xi1>, vector<32x128xf32>
    %c0_84 = arith.constant 0 : index
    %c0_85 = arith.constant 0 : index
    %c0_86 = arith.constant 0 : index
    %155 = vector.load %arg9[%c0_84, %c0_85, %c0_86] : memref<3x32x128xf32, #tpu.memory_space<vmem>>, vector<1x32x128xf32>
    %156 = vector.shape_cast %155 : vector<1x32x128xf32> to vector<32x128xf32>
    %157 = vector.shape_cast %154 : vector<32x128xf32> to vector<1x32x128xf32>
    tpu.vector_store %arg9[%c0_84, %c0_85, %c0_86], %157 {strides = array<i32>} : memref<3x32x128xf32, #tpu.memory_space<vmem>>, vector<1x32x128xf32>,
    %c127_i32_87 = arith.constant 127 : i32
    %158 = tpu.dynamic_rotate %154 by %c127_i32_87 dim 1 : vector<32x128xf32>, i32 -> vector<32x128xf32>
    %c15_i32_88 = arith.constant 15 : i32
    %159 = vector.broadcast %c15_i32_88 : i32 to vector<32x128xi32>
    %160 = arith.cmpi slt, %30, %159 : vector<32x128xi32>
    %cst_89 = arith.constant 0.000000e+00 : f32
    %161 = vector.broadcast %cst_89 : f32 to vector<32x128xf32>
    %162 = arith.select %160, %158, %161 : vector<32x128xi1>, vector<32x128xf32>
    %c1_90 = arith.constant 1 : index
    %c0_91 = arith.constant 0 : index
    %c0_92 = arith.constant 0 : index
    %163 = vector.load %arg9[%c1_90, %c0_91, %c0_92] : memref<3x32x128xf32, #tpu.memory_space<vmem>>, vector<1x32x128xf32>
    %164 = vector.shape_cast %163 : vector<1x32x128xf32> to vector<32x128xf32>
    %165 = vector.shape_cast %162 : vector<32x128xf32> to vector<1x32x128xf32>
    tpu.vector_store %arg9[%c1_90, %c0_91, %c0_92], %165 {strides = array<i32>} : memref<3x32x128xf32, #tpu.memory_space<vmem>>, vector<1x32x128xf32>,
    %c1_i32_93 = arith.constant 1 : i32
    %166 = tpu.dynamic_rotate %154 by %c1_i32_93 dim 1 : vector<32x128xf32>, i32 -> vector<32x128xf32>
    %c1_i32_94 = arith.constant 1 : i32
    %167 = vector.broadcast %c1_i32_94 : i32 to vector<32x128xi32>
    %168 = arith.cmpi sge, %30, %167 : vector<32x128xi32>
    %cst_95 = arith.constant 0.000000e+00 : f32
    %169 = vector.broadcast %cst_95 : f32 to vector<32x128xf32>
    %170 = arith.select %168, %166, %169 : vector<32x128xi1>, vector<32x128xf32>
    %c2_96 = arith.constant 2 : index
    %c0_97 = arith.constant 0 : index
    %c0_98 = arith.constant 0 : index
    %171 = vector.load %arg9[%c2_96, %c0_97, %c0_98] : memref<3x32x128xf32, #tpu.memory_space<vmem>>, vector<1x32x128xf32>
    %172 = vector.shape_cast %171 : vector<1x32x128xf32> to vector<32x128xf32>
    %173 = vector.shape_cast %170 : vector<32x128xf32> to vector<1x32x128xf32>
    tpu.vector_store %arg9[%c2_96, %c0_97, %c0_98], %173 {strides = array<i32>} : memref<3x32x128xf32, #tpu.memory_space<vmem>>, vector<1x32x128xf32>,
    %174 = vector.extract_strided_slice %136 {offsets = [8, 0], sizes = [16, 128], strides = [1, 1]} : vector<32x128xf32> to vector<16x128xf32>
    %175 = vector.extract_strided_slice %138 {offsets = [8, 0], sizes = [16, 128], strides = [1, 1]} : vector<32x128xf32> to vector<16x128xf32>
    %176 = vector.extract_strided_slice %154 {offsets = [8, 0], sizes = [16, 128], strides = [1, 1]} : vector<32x128xf32> to vector<16x128xf32>
    %177 = math.absf %174 : vector<16x128xf32>
    %178 = math.absf %175 : vector<16x128xf32>
    %cst_99 = arith.constant 0.414213181 : f32
    %179 = vector.broadcast %cst_99 : f32 to vector<16x128xf32>
    %180 = arith.mulf %179, %177 : vector<16x128xf32>
    %181 = arith.cmpf ole, %178, %180 : vector<16x128xf32>
    %cst_100 = arith.constant 2.41420674 : f32
    %182 = vector.broadcast %cst_100 : f32 to vector<16x128xf32>
    %183 = arith.mulf %182, %177 : vector<16x128xf32>
    %184 = arith.cmpf ogt, %178, %183 : vector<16x128xf32>
    %cst_101 = arith.constant 0.000000e+00 : f32
    %185 = vector.broadcast %cst_101 : f32 to vector<16x128xf32>
    %186 = arith.cmpf oge, %174, %185 : vector<16x128xf32>
    %cst_102 = arith.constant 0.000000e+00 : f32
    %187 = vector.broadcast %cst_102 : f32 to vector<16x128xf32>
    %188 = arith.cmpf oge, %175, %187 : vector<16x128xf32>
    %cst_103 = arith.constant 8.000000e+00 : f32
    %cst_104 = arith.constant 0.000000e+00 : f32
    %189 = vector.broadcast %cst_103 : f32 to vector<16x128xf32>
    %190 = vector.broadcast %cst_104 : f32 to vector<16x128xf32>
    %191 = arith.select %188, %189, %190 : vector<16x128xi1>, vector<16x128xf32>
    %cst_105 = arith.constant 4.000000e+00 : f32
    %192 = vector.broadcast %cst_105 : f32 to vector<16x128xf32>
    %193 = arith.select %186, %192, %191 : vector<16x128xi1>, vector<16x128xf32>
    %cst_106 = arith.constant 6.000000e+00 : f32
    %cst_107 = arith.constant 2.000000e+00 : f32
    %194 = vector.broadcast %cst_106 : f32 to vector<16x128xf32>
    %195 = vector.broadcast %cst_107 : f32 to vector<16x128xf32>
    %196 = arith.select %188, %194, %195 : vector<16x128xi1>, vector<16x128xf32>
    %cst_108 = arith.constant 5.000000e+00 : f32
    %cst_109 = arith.constant 3.000000e+00 : f32
    %197 = vector.broadcast %cst_108 : f32 to vector<16x128xf32>
    %198 = vector.broadcast %cst_109 : f32 to vector<16x128xf32>
    %199 = arith.select %188, %197, %198 : vector<16x128xi1>, vector<16x128xf32>
    %cst_110 = arith.constant 7.000000e+00 : f32
    %cst_111 = arith.constant 1.000000e+00 : f32
    %200 = vector.broadcast %cst_110 : f32 to vector<16x128xf32>
    %201 = vector.broadcast %cst_111 : f32 to vector<16x128xf32>
    %202 = arith.select %188, %200, %201 : vector<16x128xi1>, vector<16x128xf32>
    %203 = arith.select %186, %199, %202 : vector<16x128xi1>, vector<16x128xf32>
    %204 = arith.select %184, %196, %203 : vector<16x128xi1>, vector<16x128xf32>
    %205 = arith.select %181, %193, %204 : vector<16x128xi1>, vector<16x128xf32>
    %cst_112 = arith.constant 4.500000e+01 : f32
    %206 = vector.broadcast %cst_112 : f32 to vector<16x128xf32>
    %207 = arith.mulf %205, %206 : vector<16x128xf32>
    %cst_113 = arith.constant 8.000000e+00 : f32
    %208 = vector.broadcast %cst_113 : f32 to vector<16x128xf32>
    %209 = arith.cmpf oeq, %205, %208 : vector<16x128xf32>
    %cst_114 = arith.constant 0.000000e+00 : f32
    %210 = vector.broadcast %cst_114 : f32 to vector<16x128xf32>
    %211 = arith.select %209, %210, %205 : vector<16x128xi1>, vector<16x128xf32>
    %cst_115 = arith.constant 4.000000e+00 : f32
    %212 = vector.broadcast %cst_115 : f32 to vector<16x128xf32>
    %213 = arith.cmpf oge, %205, %212 : vector<16x128xf32>
    %cst_116 = arith.constant 4.000000e+00 : f32
    %214 = vector.broadcast %cst_116 : f32 to vector<16x128xf32>
    %215 = arith.subf %205, %214 : vector<16x128xf32>
    %cst_117 = arith.constant 4.000000e+00 : f32
    %216 = vector.broadcast %cst_117 : f32 to vector<16x128xf32>
    %217 = arith.addf %205, %216 : vector<16x128xf32>
    %218 = arith.select %213, %215, %217 : vector<16x128xi1>, vector<16x128xf32>
    %cst_118 = arith.constant 0.000000e+00 : f32
    %219 = vector.broadcast %cst_118 : f32 to vector<16x128xf32>
    %cst_119 = arith.constant 0.000000e+00 : f32
    %220 = vector.broadcast %cst_119 : f32 to vector<16x128xf32>
    %c1_120 = arith.constant 1 : index
    %c8_121 = arith.constant 8 : index
    %c0_122 = arith.constant 0 : index
    %221 = vector.load %arg9[%c1_120, %c8_121, %c0_122] : memref<3x32x128xf32, #tpu.memory_space<vmem>>, vector<1x16x128xf32>
    %222 = vector.shape_cast %221 : vector<1x16x128xf32> to vector<16x128xf32>
    %cst_123 = arith.constant 0.000000e+00 : f32
    %223 = vector.broadcast %cst_123 : f32 to vector<16x128xf32>
    %224 = arith.cmpf oeq, %211, %223 : vector<16x128xf32>
    %225 = arith.select %224, %222, %219 : vector<16x128xi1>, vector<16x128xf32>
    %cst_124 = arith.constant 0.000000e+00 : f32
    %226 = vector.broadcast %cst_124 : f32 to vector<16x128xf32>
    %227 = arith.cmpf oeq, %218, %226 : vector<16x128xf32>
    %228 = arith.select %227, %222, %220 : vector<16x128xi1>, vector<16x128xf32>
    %c1_125 = arith.constant 1 : index
    %c9_126 = arith.constant 9 : index
    %c0_127 = arith.constant 0 : index
    %229 = vector.load %arg9[%c1_125, %c9_126, %c0_127] : memref<3x32x128xf32, #tpu.memory_space<vmem>>, vector<1x16x128xf32>
    %230 = vector.shape_cast %229 : vector<1x16x128xf32> to vector<16x128xf32>
    %cst_128 = arith.constant 1.000000e+00 : f32
    %231 = vector.broadcast %cst_128 : f32 to vector<16x128xf32>
    %232 = arith.cmpf oeq, %211, %231 : vector<16x128xf32>
    %233 = arith.select %232, %230, %225 : vector<16x128xi1>, vector<16x128xf32>
    %cst_129 = arith.constant 1.000000e+00 : f32
    %234 = vector.broadcast %cst_129 : f32 to vector<16x128xf32>
    %235 = arith.cmpf oeq, %218, %234 : vector<16x128xf32>
    %236 = arith.select %235, %230, %228 : vector<16x128xi1>, vector<16x128xf32>
    %c0_130 = arith.constant 0 : index
    %c9_131 = arith.constant 9 : index
    %c0_132 = arith.constant 0 : index
    %237 = vector.load %arg9[%c0_130, %c9_131, %c0_132] : memref<3x32x128xf32, #tpu.memory_space<vmem>>, vector<1x16x128xf32>
    %238 = vector.shape_cast %237 : vector<1x16x128xf32> to vector<16x128xf32>
    %cst_133 = arith.constant 2.000000e+00 : f32
    %239 = vector.broadcast %cst_133 : f32 to vector<16x128xf32>
    %240 = arith.cmpf oeq, %211, %239 : vector<16x128xf32>
    %241 = arith.select %240, %238, %233 : vector<16x128xi1>, vector<16x128xf32>
    %cst_134 = arith.constant 2.000000e+00 : f32
    %242 = vector.broadcast %cst_134 : f32 to vector<16x128xf32>
    %243 = arith.cmpf oeq, %218, %242 : vector<16x128xf32>
    %244 = arith.select %243, %238, %236 : vector<16x128xi1>, vector<16x128xf32>
    %c2_135 = arith.constant 2 : index
    %c9_136 = arith.constant 9 : index
    %c0_137 = arith.constant 0 : index
    %245 = vector.load %arg9[%c2_135, %c9_136, %c0_137] : memref<3x32x128xf32, #tpu.memory_space<vmem>>, vector<1x16x128xf32>
    %246 = vector.shape_cast %245 : vector<1x16x128xf32> to vector<16x128xf32>
    %cst_138 = arith.constant 3.000000e+00 : f32
    %247 = vector.broadcast %cst_138 : f32 to vector<16x128xf32>
    %248 = arith.cmpf oeq, %211, %247 : vector<16x128xf32>
    %249 = arith.select %248, %246, %241 : vector<16x128xi1>, vector<16x128xf32>
    %cst_139 = arith.constant 3.000000e+00 : f32
    %250 = vector.broadcast %cst_139 : f32 to vector<16x128xf32>
    %251 = arith.cmpf oeq, %218, %250 : vector<16x128xf32>
    %252 = arith.select %251, %246, %244 : vector<16x128xi1>, vector<16x128xf32>
    %c2_140 = arith.constant 2 : index
    %c8_141 = arith.constant 8 : index
    %c0_142 = arith.constant 0 : index
    %253 = vector.load %arg9[%c2_140, %c8_141, %c0_142] : memref<3x32x128xf32, #tpu.memory_space<vmem>>, vector<1x16x128xf32>
    %254 = vector.shape_cast %253 : vector<1x16x128xf32> to vector<16x128xf32>
    %cst_143 = arith.constant 4.000000e+00 : f32
    %255 = vector.broadcast %cst_143 : f32 to vector<16x128xf32>
    %256 = arith.cmpf oeq, %211, %255 : vector<16x128xf32>
    %257 = arith.select %256, %254, %249 : vector<16x128xi1>, vector<16x128xf32>
    %cst_144 = arith.constant 4.000000e+00 : f32
    %258 = vector.broadcast %cst_144 : f32 to vector<16x128xf32>
    %259 = arith.cmpf oeq, %218, %258 : vector<16x128xf32>
    %260 = arith.select %259, %254, %252 : vector<16x128xi1>, vector<16x128xf32>
    %c2_145 = arith.constant 2 : index
    %c7_146 = arith.constant 7 : index
    %c0_147 = arith.constant 0 : index
    %261 = vector.load %arg9[%c2_145, %c7_146, %c0_147] : memref<3x32x128xf32, #tpu.memory_space<vmem>>, vector<1x16x128xf32>
    %262 = vector.shape_cast %261 : vector<1x16x128xf32> to vector<16x128xf32>
    %cst_148 = arith.constant 5.000000e+00 : f32
    %263 = vector.broadcast %cst_148 : f32 to vector<16x128xf32>
    %264 = arith.cmpf oeq, %211, %263 : vector<16x128xf32>
    %265 = arith.select %264, %262, %257 : vector<16x128xi1>, vector<16x128xf32>
    %cst_149 = arith.constant 5.000000e+00 : f32
    %266 = vector.broadcast %cst_149 : f32 to vector<16x128xf32>
    %267 = arith.cmpf oeq, %218, %266 : vector<16x128xf32>
    %268 = arith.select %267, %262, %260 : vector<16x128xi1>, vector<16x128xf32>
    %c0_150 = arith.constant 0 : index
    %c7_151 = arith.constant 7 : index
    %c0_152 = arith.constant 0 : index
    %269 = vector.load %arg9[%c0_150, %c7_151, %c0_152] : memref<3x32x128xf32, #tpu.memory_space<vmem>>, vector<1x16x128xf32>
    %270 = vector.shape_cast %269 : vector<1x16x128xf32> to vector<16x128xf32>
    %cst_153 = arith.constant 6.000000e+00 : f32
    %271 = vector.broadcast %cst_153 : f32 to vector<16x128xf32>
    %272 = arith.cmpf oeq, %211, %271 : vector<16x128xf32>
    %273 = arith.select %272, %270, %265 : vector<16x128xi1>, vector<16x128xf32>
    %cst_154 = arith.constant 6.000000e+00 : f32
    %274 = vector.broadcast %cst_154 : f32 to vector<16x128xf32>
    %275 = arith.cmpf oeq, %218, %274 : vector<16x128xf32>
    %276 = arith.select %275, %270, %268 : vector<16x128xi1>, vector<16x128xf32>
    %c1_155 = arith.constant 1 : index
    %c7_156 = arith.constant 7 : index
    %c0_157 = arith.constant 0 : index
    %277 = vector.load %arg9[%c1_155, %c7_156, %c0_157] : memref<3x32x128xf32, #tpu.memory_space<vmem>>, vector<1x16x128xf32>
    %278 = vector.shape_cast %277 : vector<1x16x128xf32> to vector<16x128xf32>
    %cst_158 = arith.constant 7.000000e+00 : f32
    %279 = vector.broadcast %cst_158 : f32 to vector<16x128xf32>
    %280 = arith.cmpf oeq, %211, %279 : vector<16x128xf32>
    %281 = arith.select %280, %278, %273 : vector<16x128xi1>, vector<16x128xf32>
    %cst_159 = arith.constant 7.000000e+00 : f32
    %282 = vector.broadcast %cst_159 : f32 to vector<16x128xf32>
    %283 = arith.cmpf oeq, %218, %282 : vector<16x128xf32>
    %284 = arith.select %283, %278, %276 : vector<16x128xi1>, vector<16x128xf32>
    %285 = arith.subf %176, %281 : vector<16x128xf32>
    %286 = arith.subf %176, %284 : vector<16x128xf32>
    %287 = arith.minimumf %285, %286 : vector<16x128xf32>
    %cst_160 = arith.constant 0.000000e+00 : f32
    %288 = vector.broadcast %cst_160 : f32 to vector<16x128xf32>
    %289 = arith.cmpf ogt, %287, %288 : vector<16x128xf32>
    %cst_161 = arith.constant 0.000000e+00 : f32
    %290 = vector.broadcast %cst_161 : f32 to vector<16x128xf32>
    %291 = arith.select %289, %176, %290 : vector<16x128xi1>, vector<16x128xf32>
    %c0_162 = arith.constant 0 : index
    %c0_163 = arith.constant 0 : index
    %c0_164 = arith.constant 0 : index
    %c0_165 = arith.constant 0 : index
    %292 = vector.load %arg4[%c0_162, %c0_163, %c0_164, %c0_165] : memref<1x1x16x128xf32, #tpu.memory_space<vmem>>, vector<1x1x16x128xf32>
    %293 = vector.shape_cast %292 : vector<1x1x16x128xf32> to vector<16x128xf32>
    %294 = vector.shape_cast %176 : vector<16x128xf32> to vector<1x1x16x128xf32>
    tpu.vector_store %arg4[%c0_162, %c0_163, %c0_164, %c0_165], %294 {strides = array<i32>} : memref<1x1x16x128xf32, #tpu.memory_space<vmem>>, vector<1x1x16x128xf32>,
    %c0_166 = arith.constant 0 : index
    %c0_167 = arith.constant 0 : index
    %c0_168 = arith.constant 0 : index
    %c0_169 = arith.constant 0 : index
    %295 = vector.load %arg5[%c0_166, %c0_167, %c0_168, %c0_169] : memref<1x1x16x128xf32, #tpu.memory_space<vmem>>, vector<1x1x16x128xf32>
    %296 = vector.shape_cast %295 : vector<1x1x16x128xf32> to vector<16x128xf32>
    %297 = vector.shape_cast %207 : vector<16x128xf32> to vector<1x1x16x128xf32>
    tpu.vector_store %arg5[%c0_166, %c0_167, %c0_168, %c0_169], %297 {strides = array<i32>} : memref<1x1x16x128xf32, #tpu.memory_space<vmem>>, vector<1x1x16x128xf32>,
    %c0_170 = arith.constant 0 : index
    %c0_171 = arith.constant 0 : index
    %c0_172 = arith.constant 0 : index
    %c0_173 = arith.constant 0 : index
    %298 = vector.load %arg6[%c0_170, %c0_171, %c0_172, %c0_173] : memref<1x1x16x128xf32, #tpu.memory_space<vmem>>, vector<1x1x16x128xf32>
    %299 = vector.shape_cast %298 : vector<1x1x16x128xf32> to vector<16x128xf32>
    %300 = vector.shape_cast %291 : vector<16x128xf32> to vector<1x1x16x128xf32>
    tpu.vector_store %arg6[%c0_170, %c0_171, %c0_172, %c0_173], %300 {strides = array<i32>} : memref<1x1x16x128xf32, #tpu.memory_space<vmem>>, vector<1x1x16x128xf32>,
    return
  }
  func.func @transform_1(%arg0: i32) -> (i32, i32) {
    %c0_i32 = arith.constant 0 : i32
    %c0_i32_0 = arith.constant 0 : i32
    %c0_i32_1 = arith.constant 0 : i32
    return %c0_i32, %c0_i32_0 : i32, i32
  }
  func.func @transform_2(%arg0: i32) -> (i32, i32, i32, i32) {
    %c0_i32 = arith.constant 0 : i32
    %c0_i32_0 = arith.constant 0 : i32
    %c0_i32_1 = arith.constant 0 : i32
    %c0_i32_2 = arith.constant 0 : i32
    return %c0_i32, %c0_i32_0, %arg0, %c0_i32_1 : i32, i32, i32, i32
  }
  func.func @transform_3(%arg0: i32) -> (i32, i32, i32, i32) {
    %c0_i32 = arith.constant 0 : i32
    %c0_i32_0 = arith.constant 0 : i32
    %c0_i32_1 = arith.constant 0 : i32
    %c0_i32_2 = arith.constant 0 : i32
    return %c0_i32, %c0_i32_0, %arg0, %c0_i32_1 : i32, i32, i32, i32
  }
  func.func @transform_4(%arg0: i32) -> (i32, i32, i32, i32) {
    %c0_i32 = arith.constant 0 : i32
    %c0_i32_0 = arith.constant 0 : i32
    %c0_i32_1 = arith.constant 0 : i32
    %c0_i32_2 = arith.constant 0 : i32
    return %c0_i32, %c0_i32_0, %arg0, %c0_i32_1 : i32, i32, i32, i32
  }
  func.func @transform_5(%arg0: i32) -> (i32, i32, i32, i32) {
    %c0_i32 = arith.constant 0 : i32
    %c0_i32_0 = arith.constant 0 : i32
    %c0_i32_1 = arith.constant 0 : i32
    %c0_i32_2 = arith.constant 0 : i32
    return %c0_i32, %c0_i32_0, %arg0, %c0_i32_1 : i32, i32, i32, i32
  }
}

</mosaic_0001>

<bundles_post_ra>
// kernel: tpu_custom_call.1
= control target key start
LH: loop header
LB: loop body
LE: loop exit
PB: predicated region body
PF: predicated region fallthrough
CT: control target
= control target key end

     0   :  { %11 = vsyncpa [#allocation7], 0  ;;  %s4096_s0 = inlined_call_operand.hbm [shape: f32[3,32,128], index: 0, kind: input, shape index: {}]   ;;  %s4097_s1 = inlined_call_operand.hbm [shape: f32[128,128], index: 1, kind: input, shape index: {}]   ;;  %s4098_s2 = inlined_call_operand.hbm [shape: f32[1,3,16,128], index: 2, kind: output, shape index: {0}]   ;;  %s4099_s3 = inlined_call_operand.hbm [shape: f32[1,1,16,128], index: 3, kind: output, shape index: {1}]   ;;  %s4100_s4 = inlined_call_operand.hbm [shape: f32[1,1,16,128], index: 4, kind: output, shape index: {2}]   ;;  %s4101_s5 = inlined_call_operand.hbm [shape: f32[1,1,16,128], index: 5, kind: output, shape index: {3}]  }
   0x1   :  { %12 = vsyncpa [#allocation8], 0 }
   0x2   :  { %13 = vsyncpa [#allocation11], 0 }
   0x3   :  { %14 = vsyncpa [#allocation14], 0  ;;  %s3095_s18 = smov [#allocation6]   ;;  %s2899_s22 = scalar_lea.hbm %s4097_s1, 2048 }
   0x4   :  { %s20_s19 = sshll.u32 %s3095_s18, 4  ;;  %p2900_p0 = scmp.ne.s32.totalorder %s4097_s1, %s2899_s22  ;;  %s21_s19 = int_to_ptr.vmem [resolvable:$true] %s20_s19 }
   0x5   :  { %p2903_p1 = scmp.lt.u32.totalorder %s2899_s22, %s4097_s1 }
   0x7   :  { %p2905_p2 = pnand %p2903_p1, %p2900_p0 }
   0x9   :  { %2908 = shalt.err (!%p2905_p2)
}
   0xa   :  { %s2909_s27 = scalar_lea.vmem %s21_s19, 2048  ;;  %p2914_p4 = scmp.lt.s32.totalorder %s21_s19, %s21_s19 }
   0xb   :  { %p2910_p3 = scmp.ne.s32.totalorder %s21_s19, %s2909_s27  ;;  %p2915_p5 = scmp.lt.s32.totalorder %s2909_s27, %s2909_s27 }
   0xd   :  { %p2916_p6 = por %p2915_p5, %p2914_p4 }
   0xf   :  { %p2917_p7 = pnand %p2916_p6, %p2910_p3 }
  0x11   :  { %2920 = shalt.err (!%p2917_p7)
}
  0x12   :  { %s3096_s28 = smov 128   ;;  %s3097_s29 = smov 8  }
  0x13   :  { %26 = dma.hbm_to_vmem [thread:$0]  %s4097_s1, 2048, %s21_s19, [#allocation7], %s3096_s28, %s3096_s28, %s3097_s29  }
  0x14   :  { %3081 = dma.done.wait [#allocation7], 2048  }
  0x15   :  { %3082 = vsyncadd [#allocation7], 4294965248  ;;  %v104_v0 = vlaneseq  ;;  %s3160_s9 = scalar_lea.hbm %s4096_s0, 512  ;;  %v3098_v1 = vmov 0.0   ;;  %s3099_s10 = smov [#allocation2 + $0x8]  }
  0x16   :  { %31 = vst [vmem:[#allocation2] sm:$0xff] %v3098_v1  ;;  %32 = vst [vmem:[#allocation2 + $0x68] sm:$0xff] %v3098_v1  ;;  %s45_s11 = sshll.u32 %s3099_s10, 4  ;;  %s3100_s1 = smov [#allocation2 + $0x28]   ;;  %s46_s11 = int_to_ptr.vmem [resolvable:$true] %s45_s11 }
  0x17   :  { %v3164_v2 = vand.u32 127, %v104_v0  ;;  %s61_s12 = sshll.u32 %s3100_s1, 4  ;;  %p2922_p8 = scmp.ne.s32.totalorder %s4096_s0, %s3160_s9  ;;  %s62_s12 = int_to_ptr.vmem [resolvable:$true] %s61_s12 }
  0x18   :  { %s3173_s17 = scalar_lea.hbm %s4096_s0, 1536  ;;  %p2925_p10 = scmp.lt.u32.totalorder %s3160_s9, %s4096_s0 }
  0x19   :  { %4120 = vst [vmem:[#allocation30_spill] sm:$0xff] %v3164_v2  ;;  %p2924_p9 = scmp.lt.u32.totalorder %s3173_s17, %s3160_s9 }
  0x1b   :  { %p2926_p11 = por %p2925_p10, %p2924_p9 }
  0x1d   :  { %p2927_p12 = pnand %p2926_p11, %p2922_p8 }
  0x1f   :  { %2930 = shalt.err (!%p2927_p12)  }
  0x20   :  { %s2931_s22 = scalar_lea.vmem %s46_s11, 512  ;;  %s3101_s23 = smov [#allocation2]  }
  0x21   :  { %p2932_p13 = scmp.ne.s32.totalorder %s46_s11, %s2931_s22  ;;  %s2933_s24 = sshll.u32 %s3101_s23, 4  ;;  %s3186_s24 = int_to_ptr.vmem [resolvable:$false] %s2933_s24 }
  0x22   :  { %s3189_s25 = scalar_lea.vmem %s3186_s24, 1792  ;;  %p2936_p0 = scmp.lt.s32.totalorder %s46_s11, %s3186_s24 }
  0x23   :  { %p2937_p1 = scmp.lt.s32.totalorder %s3189_s25, %s2931_s22 }
  0x25   :  { %p2938_p2 = por %p2937_p1, %p2936_p0 }
  0x27   :  { %p2939_p3 = pnand %p2938_p2, %p2932_p13 }
  0x29   :  { %2942 = shalt.err (!%p2939_p3)  }
  0x2a   :  { %48 = dma.hbm_to_vmem [thread:$0]  %s4096_s0, 512, %s46_s11, [#allocation5] }
  0x2b   :  { %s3199_s7 = scalar_lea.hbm %s4096_s0, 1024 }
  0x2c   :  { %p2944_p4 = scmp.ne.s32.totalorder %s3160_s9, %s3199_s7  ;;  %p2947_p5 = scmp.lt.u32.totalorder %s3173_s17, %s3199_s7 }
  0x2d   :  { %p2949_p7 = scmp.lt.u32.totalorder %s3199_s7, %s3160_s9 }
  0x2e   :  { %p2948_p6 = por %p2947_p5, %p2925_p10 }
  0x30   :  { %p2950_p8 = por %p2949_p7, %p2948_p6 }
  0x32   :  { %p2951_p9 = pnand %p2950_p8, %p2944_p4 }
  0x34   :  { %2954 = shalt.err (!%p2951_p9)  }
  0x35   :  { %s2955_s11 = scalar_lea.vmem %s62_s12, 512  ;;  %p2960_p12 = scmp.lt.s32.totalorder %s62_s12, %s3186_s24 }
  0x36   :  { %p2956_p11 = scmp.ne.s32.totalorder %s62_s12, %s2955_s11  ;;  %p2961_p13 = scmp.lt.s32.totalorder %s3189_s25, %s2955_s11 }
  0x38   :  { %p2962_p0 = por %p2961_p13, %p2960_p12 }
  0x3a   :  { %p2963_p1 = pnand %p2962_p0, %p2956_p11 }
  0x3c   :  { %2966 = shalt.err (!%p2963_p1)  }
  0x3d   :  { %64 = dma.hbm_to_vmem [thread:$0]  %s3160_s9, 512, %s62_s12, [#allocation5 + $0x1] }
  0x3e   :  { %s3102_s1 = smov [#allocation2 + $0x48]   ;;  %p2969_p10 = scmp.ne.s32.totalorder %s3199_s7, %s3173_s17 }
  0x3f   :  { %s77_s13 = sshll.u32 %s3102_s1, 4  ;;  %p2971_p2 = scmp.lt.u32.totalorder %s3199_s7, %s4096_s0  ;;  %s78_s13 = int_to_ptr.vmem [resolvable:$true] %s77_s13 }
  0x40   :  { %p2972_p3 = scmp.lt.u32.totalorder %s3173_s17, %s3173_s17 }
  0x42   :  { %p2973_p4 = por %p2972_p3, %p2971_p2 }
  0x44   :  { %p2975_p6 = por %p2973_p4, %p2947_p5 }
  0x46   :  { %p2976_p7 = pnand %p2975_p6, %p2969_p10 }
  0x48   :  { %2979 = shalt.err (!%p2976_p7)  }
  0x49   :  { %s2980_s16 = scalar_lea.vmem %s78_s13, 512  ;;  %p2985_p9 = scmp.lt.s32.totalorder %s78_s13, %s3186_s24 }
  0x4a   :  { %p2981_p8 = scmp.ne.s32.totalorder %s78_s13, %s2980_s16  ;;  %p2986_p11 = scmp.lt.s32.totalorder %s3189_s25, %s2980_s16 }
  0x4c   :  { %p2987_p12 = por %p2986_p11, %p2985_p9 }
  0x4e   :  { %p2988_p13 = pnand %p2987_p12, %p2981_p8 }
  0x50   :  { %2991 = shalt.err (!%p2988_p13)  }
  0x51   :  { %80 = dma.hbm_to_vmem [thread:$0]  %s3199_s7, 512, %s78_s13, [#allocation5 + $0x2] }
  0x52   :  { %3083 = dma.done.wait [#allocation5], 512 }
  0x53   :  { %3084 = vsyncadd [#allocation5], 4294966784 }
  0x54   :  { %3085 = dma.done.wait [#allocation5 + $0x1], 512 }
  0x55   :  { %3086 = vsyncadd [#allocation5 + $0x1], 4294966784 }
  0x56   :  { %3087 = dma.done.wait [#allocation5 + $0x2], 512 }
  0x57   :  { %3088 = vsyncadd [#allocation5 + $0x2], 4294966784  ;;  %1415 = vst [vmem:[#allocation3 + $0x8] sm:$0xff] %v3098_v1  ;;  %v281_v3 = vld [vmem:[#allocation6] sm:$0xff]  ;;  %v282_v4 = vld [vmem:[#allocation6 + $0x8] sm:$0xff]  ;;  %s3103_s0 = smov 1  }
  0x58   :  { %1418 = vst [vmem:[#allocation3 + $0x20] sm:$0xff] %v3098_v1  ;;  %1425 = vst [vmem:[#allocation3 + $0x28] sm:$0xff] %v3098_v1  ;;  %v3240_v5 = vld [vmem:[#allocation6 + $0x10] sm:$0xff]  ;;  %v298_v6 = vand.u32 4294901760, %v281_v3  ;;  %v301_v7 = vand.u32 4294901760, %v282_v4  ;;  %v3242_v8 = vld [vmem:[#allocation6 + $0x18] sm:$0xff] }
  0x59   :  { %1428 = vst [vmem:[#allocation3 + $0x40] sm:$0xff] %v3098_v1  ;;  %1436 = vst [vmem:[#allocation3 + $0x48] sm:$0xff] %v3098_v1  ;;  %v304_v9 = vand.u32 4294901760, %v3240_v5  ;;  %v3245_v10 = vld [vmem:[#allocation6 + $0x20] sm:$0xff]  ;;  %v3247_v11 = vld [vmem:[#allocation6 + $0x28] sm:$0xff]  ;;  %v307_v12 = vand.u32 4294901760, %v3242_v8 }
  0x5a   :  { %1439 = vst [vmem:[#allocation3 + $0x60] sm:$0xff] %v3098_v1  ;;  %1885 = vst [vmem:[#allocation4] sm:$0xff] %v3098_v1  ;;  %v310_v13 = vand.u32 4294901760, %v3245_v10  ;;  %v313_v14 = vand.u32 4294901760, %v3247_v11  ;;  %v3252_v15 = vld [vmem:[#allocation6 + $0x30] sm:$0xff]  ;;  %v3254_v16 = vld [vmem:[#allocation6 + $0x38] sm:$0xff]  ;;  %v3258_v18 = vpack.c.bf16 %v301_v7, %v298_v6  ;;  %v3332_v54 = vsub.f32 %v281_v3, %v298_v6 }
  0x5b   :  { %1888 = vst [vmem:[#allocation4 + $0x18] sm:$0xff] %v3098_v1  ;;  %v3256_v17 = vld [vmem:[#allocation6 + $0x40] sm:$0xff]  ;;  %v316_v19 = vand.u32 4294901760, %v3252_v15  ;;  %v319_v20 = vand.u32 4294901760, %v3254_v16  ;;  %v3262_v21 = vld [vmem:[#allocation6 + $0x48] sm:$0xff]  ;;  %v3265_v23 = vld [vmem:[#allocation6 + $0x50] sm:$0xff]  ;;  %v3273_v25 = vpack.c.bf16 %v307_v12, %v304_v9  ;;  %v3334_v58 = vsub.f32 %v282_v4, %v301_v7 }
  0x5c   :  { %v4110_v22 = vand.u32 4294901760, %v3256_v17  ;;  %v3267_v24 = vld [vmem:[#allocation6 + $0x58] sm:$0xff]  ;;  %v3279_v26 = vpack.c.bf16 %v313_v14, %v310_v13  ;;  %v4109_v27 = vand.u32 4294901760, %v3262_v21  ;;  %v4107_v28 = vand.u32 4294901760, %v3265_v23  ;;  %v3283_v29 = vld [vmem:[#allocation6 + $0x60] sm:$0xff]  ;;  %v3285_v30 = vld [vmem:[#allocation6 + $0x68] sm:$0xff]  ;;  %2625 = vmatprep.subr.bf16.mxu1 %v3258_v18  ;;  %2721 = vmatprep.subr.bf16.mxu0 %v3258_v18 }
  0x5d   :  { %v3287_v31 = vld [vmem:[#allocation6 + $0x70] sm:$0xff]  ;;  %v3295_v32 = vpack.c.bf16 %v319_v20, %v316_v19  ;;  %v4106_v33 = vand.u32 4294901760, %v3267_v24  ;;  %v4105_v34 = vand.u32 4294901760, %v3283_v29  ;;  %v4104_v35 = vand.u32 4294901760, %v3285_v30  ;;  %v3300_v36 = vld [vmem:[#allocation6 + $0x78] sm:$0xff]  ;;  %v113_v37 = vld [vmem:[#allocation2 + $0x6] sm:$0xff]  ;;  %2627 = vmatpush3.bf16.msra.mxu1 %v3258_v18  ;;  %2723 = vmatpush3.bf16.msra.mxu0 %v3258_v18 }
  0x5e   :  { %v137_v38 = vld [vmem:[#allocation2 + $0x7] sm:$0xff]  ;;  %v3308_v39 = vpack.c.bf16 %v4109_v27, %v4110_v22  ;;  %v4103_v40 = vand.u32 4294901760, %v3287_v31  ;;  %v4102_v41 = vand.u32 4294901760, %v3300_v36  ;;  %v125_v42 = vmul.f32 0.054488685, %v113_v37  ;;  %2629 = vmatprep.subr.bf16.mxu1 %v3273_v25  ;;  %2725 = vmatprep.subr.bf16.mxu0 %v3273_v25  ;;  %v138_v55 = vld [vmem:[#allocation2 + $0xf] sm:$0xff] }
  0x5f   :  { %v173_v43 = vld [vmem:[#allocation2 + $0x8] sm:$0xff]  ;;  %v3318_v45 = vpack.c.bf16 %v4106_v33, %v4107_v28  ;;  %v3324_v46 = vpack.c.bf16 %v4104_v35, %v4105_v34  ;;  %v149_v47 = vmul.f32 0.24420135, %v137_v38  ;;  %v174_v56 = vld [vmem:[#allocation2 + $0x10] sm:$0xff]  ;;  %v150_v60 = vmul.f32 0.24420135, %v138_v55 }
  0x60   :  { %v209_v44 = vld [vmem:[#allocation2 + $0x9] sm:$0xff]  ;;  %v185_v48 = vmul.f32 0.40261996, %v173_v43  ;;  %v3330_v51 = vpack.c.bf16 %v4102_v41, %v4103_v40  ;;  %v210_v61 = vld [vmem:[#allocation2 + $0x11] sm:$0xff]  ;;  %v501_v63 = vand.u32 4294901760, %v3332_v54  ;;  %v3342_v3 = vsub.f32 %v3240_v5, %v304_v9  ;;  %v176_v41 = vld [vmem:[#allocation2 + $0x20] sm:$0xff] }
  0x61   :  { %4121 = vst [vmem:[#allocation31_spill] sm:$0xff] %v3318_v45  ;;  %4122 = vst [vmem:[#allocation32_spill] sm:$0xff] %v3324_v46  ;;  %v245_v49 = vld [vmem:[#allocation2 + $0xa] sm:$0xff]  ;;  %v221_v52 = vmul.f32 0.24420135, %v209_v44  ;;  %v161_v57 = vadd.f32 %v149_v47, %v125_v42  ;;  %v246_v62 = vld [vmem:[#allocation2 + $0x12] sm:$0xff]  ;;  %2631 = vmatpush3.bf16.msra.mxu1 %v3273_v25  ;;  %2727 = vmatpush3.bf16.msra.mxu0 %v3273_v25  ;;  %v3352_v43 = vsub.f32 %v3242_v8, %v307_v12 }
  0x62   :  { %v114_v50 = vld [vmem:[#allocation2 + $0xe] sm:$0xff]  ;;  %4123 = vst [vmem:[#allocation33_spill] sm:$0xff] %v3330_v51  ;;  %v257_v53 = vmul.f32 0.054488685, %v245_v49  ;;  %v186_v0 = vmul.f32 0.40261996, %v174_v56  ;;  %2633 = vmatprep.subr.bf16.mxu1 %v3279_v26  ;;  %2729 = vmatprep.subr.bf16.mxu0 %v3279_v26  ;;  %v502_v38 = vsub.f32 %v3332_v54, %v501_v63  ;;  %v3357_v5 = vsub.f32 %v3245_v10, %v310_v13 }
  0x63   :  { %v126_v59 = vmul.f32 0.054488685, %v114_v50  ;;  %v222_v1 = vmul.f32 0.24420135, %v210_v61  ;;  %v197_v4 = vadd.f32 %v185_v48, %v161_v57  ;;  %v508_v6 = vand.u32 4294901760, %v3334_v58  ;;  %v115_v56 = vld [vmem:[#allocation2 + $0x16] sm:$0xff] }
  0x64   :  { %v258_v37 = vmul.f32 0.054488685, %v246_v62  ;;  %v515_v42 = vand.u32 4294901760, %v3342_v3  ;;  %v503_v49 = vand.u32 4294901760, %v502_v38  ;;  %v522_v8 = vand.u32 4294901760, %v3352_v43  ;;  %v139_v57 = vld [vmem:[#allocation2 + $0x17] sm:$0xff] }
  0x65   :  { %v162_v7 = vadd.f32 %v150_v60, %v126_v59  ;;  %v233_v9 = vadd.f32 %v221_v52, %v197_v4  ;;  %v509_v44 = vsub.f32 %v3334_v58, %v508_v6  ;;  %v3360_v47 = vpack.c.bf16 %v508_v6, %v501_v63  ;;  %2635 = vmatpush3.bf16.msra.mxu1 %v3279_v26  ;;  %v175_v4 = vld [vmem:[#allocation2 + $0x18] sm:$0xff]  ;;  %v118_v34 = vld [vmem:[#allocation2 + $0x2e] sm:$0xff]  ;;  %s3104_s9 = smov 127   ;;  %s3108_s12 = smov [#allocation10]  }
  0x66   :  { %2731 = vmatpush3.bf16.msra.mxu0 %v3279_v26  ;;  %v516_v50 = vsub.f32 %v3342_v3, %v515_v42  ;;  %v529_v12 = vand.u32 4294901760, %v3357_v5  ;;  %2637 = vmatprep.subr.bf16.mxu1 %v3295_v32  ;;  %v3372_v55 = vsub.f32 %v3247_v11, %v313_v14  ;;  %v523_v60 = vsub.f32 %v3352_v43, %v522_v8  ;;  %v211_v6 = vld [vmem:[#allocation2 + $0x19] sm:$0xff]  ;;  %v214_v27 = vld [vmem:[#allocation2 + $0x31] sm:$0xff]  ;;  %s2082_s17 = sshll.u32 %s3108_s12, 4  ;;  %s3109_s18 = smov [#allocation9]   ;;  %s3881_s17 = int_to_ptr.vmem [resolvable:$true] %s2082_s17 }
  0x67   :  { %v198_v48 = vadd.f32 %v186_v0, %v162_v7  ;;  %2733 = vmatprep.subr.bf16.mxu0 %v3295_v32  ;;  %v269_v10 = vadd.f32 %v257_v53, %v233_v9  ;;  %v510_v13 = vand.u32 4294901760, %v509_v44  ;;  %v3375_v61 = vpack.c.bf16 %v522_v8, %v515_v42  ;;  %v247_v11 = vld [vmem:[#allocation2 + $0x1a] sm:$0xff]  ;;  %s2070_s19 = sshll.u32 %s3109_s18, 4  ;;  %s2071_s19 = int_to_ptr.vmem [resolvable:$true] %s2070_s19 }
  0x68   :  { %v517_v59 = vand.u32 4294901760, %v516_v50  ;;  %v530_v62 = vsub.f32 %v3357_v5, %v529_v12  ;;  %v524_v14 = vand.u32 4294901760, %v523_v60  ;;  %v127_v38 = vmul.f32 0.054488685, %v115_v56  ;;  %v140_v56 = vld [vmem:[#allocation2 + $0x1f] sm:$0xff]  ;;  %s2993_s20 = scalar_lea.vmem %s2071_s19, 768  ;;  %p2998_p0 = scmp.lt.s32.totalorder %s2071_s19, %s2071_s19 }
  0x69   :  { %v234_v52 = vadd.f32 %v222_v1, %v198_v48  ;;  %v3378_v63 = vand.u32 4294901760, %v269_v10  ;;  %v3380_v0 = vpack.c.bf16 %v510_v13, %v503_v49  ;;  %v536_v1 = vand.u32 4294901760, %v3372_v55  ;;  %2639 = vmatpush3.bf16.msra.mxu1 %v3295_v32  ;;  %v116_v49 = vld [vmem:[#allocation2 + $0x1e] sm:$0xff]  ;;  %p2994_p5 = scmp.ne.s32.totalorder %s2071_s19, %s2993_s20  ;;  %p2999_p1 = scmp.lt.s32.totalorder %s2993_s20, %s2993_s20 }
  0x6a   :  { %2735 = vmatpush3.bf16.msra.mxu0 %v3295_v32  ;;  %v531_v7 = vand.u32 4294901760, %v530_v62  ;;  %v151_v42 = vmul.f32 0.24420135, %v139_v57  ;;  %2641 = vmatprep.subr.bf16.mxu1 %v3308_v39  ;;  %v3395_v50 = vpack.c.bf16 %v524_v14, %v517_v59  ;;  %v187_v13 = vmul.f32 0.40261996, %v175_v4  ;;  %v212_v4 = vld [vmem:[#allocation2 + $0x21] sm:$0xff] }
  0x6b   :  { %v270_v53 = vadd.f32 %v258_v37, %v234_v52  ;;  %2737 = vmatprep.subr.bf16.mxu0 %v3308_v39  ;;  %v3388_v9 = vsub.f32 %v269_v10, %v3378_v63  ;;  %v537_v44 = vsub.f32 %v3372_v55, %v536_v1  ;;  %v3393_v48 = vpack.c.bf16 %v536_v1, %v529_v12  ;;  %p3000_p10 = por %p2999_p1, %p2998_p0 }
  0x6c   :  { %v163_v8 = vadd.f32 %v151_v42, %v127_v38  ;;  %v223_v52 = vmul.f32 0.24420135, %v211_v6  ;;  %v259_v62 = vmul.f32 0.054488685, %v247_v11  ;;  %v3406_v59 = vsub.f32 %v3252_v15, %v316_v19  ;;  %v248_v15 = vld [vmem:[#allocation2 + $0x22] sm:$0xff] }
  0x6d   :  { %4124 = vst [vmem:[#allocation34_spill] sm:$0xff] %v3388_v9  ;;  %v3390_v37 = vand.u32 4294901760, %v270_v53  ;;  %v380_v57 = vand.u32 4294901760, %v3388_v9  ;;  %v538_v10 = vand.u32 4294901760, %v537_v44  ;;  %2643 = vmatpush3.bf16.msra.mxu1 %v3308_v39  ;;  %v3411_v1 = vsub.f32 %v3254_v16, %v319_v20  ;;  %v117_v44 = vld [vmem:[#allocation2 + $0x26] sm:$0xff]  ;;  %p3001_p2 = pnand %p3000_p10, %p2994_p5 }
  0x6e   :  { %2739 = vmatpush3.bf16.msra.mxu0 %v3308_v39  ;;  %v199_v12 = vadd.f32 %v187_v13, %v163_v8  ;;  %2645 = vmatprep.subr.bf16.mxu1 %v3318_v45  ;;  %v152_v38 = vmul.f32 0.24420135, %v140_v56  ;;  %v543_v42 = vand.u32 4294901760, %v3406_v59  ;;  %v188_v20 = vmul.f32 0.40261996, %v176_v41 }
  0x6f   :  { %v3399_v60 = vsub.f32 %v270_v53, %v3390_v37  ;;  %v128_v53 = vmul.f32 0.054488685, %v116_v49  ;;  %2741 = vmatprep.subr.bf16.mxu0 %v3318_v45  ;;  %v381_v6 = vsub.f32 %v3388_v9, %v380_v57  ;;  %v3417_v14 = vpack.c.bf16 %v538_v10, %v531_v7  ;;  %2506 = vmatprep.mubr.f32.mxu0 %v380_v57  ;;  %v141_v7 = vld [vmem:[#allocation2 + $0x27] sm:$0xff] }
  0x70   :  { %v235_v19 = vadd.f32 %v223_v52, %v199_v12  ;;  %v550_v16 = vand.u32 4294901760, %v3411_v1  ;;  %v224_v40 = vmul.f32 0.24420135, %v212_v4  ;;  %v544_v56 = vsub.f32 %v3406_v59, %v543_v42  ;;  %v177_v10 = vld [vmem:[#allocation2 + $0x28] sm:$0xff] }
  0x71   :  { %v4108_v11 = vand.u32 4294901760, %v3399_v60  ;;  %v382_v49 = vand.u32 4294901760, %v381_v6  ;;  %v164_v13 = vadd.f32 %v152_v38, %v128_v53  ;;  %2647 = vmatpush3.bf16.msra.mxu1 %v3318_v45  ;;  %v260_v41 = vmul.f32 0.054488685, %v248_v15  ;;  %v213_v12 = vld [vmem:[#allocation2 + $0x29] sm:$0xff] }
  0x72   :  { %2743 = vmatpush3.bf16.msra.mxu0 %v3318_v45  ;;  %v271_v52 = vadd.f32 %v259_v62, %v235_v19  ;;  %v551_v57 = vsub.f32 %v3411_v1, %v550_v16  ;;  %v249_v6 = vld [vmem:[#allocation2 + $0x2a] sm:$0xff]  ;;  %2649 = vmatprep.subr.bf16.mxu1 %v3324_v46  ;;  %v3433_v4 = vpack.c.bf16 %v550_v16, %v543_v42  ;;  %v129_v35 = vmul.f32 0.054488685, %v117_v44 }
  0x73   :  { %v3424_v8 = vsub.f32 %v3399_v60, %v4108_v11  ;;  %2745 = vmatprep.subr.bf16.mxu0 %v3324_v46  ;;  %v200_v38 = vadd.f32 %v188_v20, %v164_v13  ;;  %v142_v62 = vld [vmem:[#allocation2 + $0x2f] sm:$0xff]  ;;  %2356 = vmatprep.mubr.f32.mxu1 %v382_v49  ;;  %v545_v15 = vand.u32 4294901760, %v544_v56  ;;  %v153_v11 = vmul.f32 0.24420135, %v141_v7 }
  0x74   :  { %v178_v19 = vld [vmem:[#allocation2 + $0x30] sm:$0xff]  ;;  %v3435_v33 = vand.u32 4294901760, %v271_v52  ;;  %v552_v28 = vand.u32 4294901760, %v551_v57  ;;  %v189_v2 = vmul.f32 0.40261996, %v177_v10  ;;  %v4127_v13 = vand.u32 4294901760, %v3262_v21 }
  0x75   :  { %v392_v53 = vand.u32 4294901760, %v3424_v8  ;;  %v236_v22 = vadd.f32 %v224_v40, %v200_v38  ;;  %v225_v9 = vmul.f32 0.24420135, %v213_v12  ;;  %v261_v45 = vmul.f32 0.054488685, %v249_v6  ;;  %2651 = vmatpush3.bf16.msra.mxu1 %v3324_v46  ;;  %v119_v56 = vld [vmem:[#allocation2 + $0x36] sm:$0xff] }
  0x76   :  { %2747 = vmatpush3.bf16.msra.mxu0 %v3324_v46  ;;  %v3440_v42 = vsub.f32 %v271_v52, %v3435_v33  ;;  %v3442_v16 = vpack.c.bf16 %v552_v28, %v545_v15  ;;  %v165_v20 = vadd.f32 %v153_v11, %v129_v35  ;;  %v130_v44 = vmul.f32 0.054488685, %v118_v34  ;;  %2653 = vmatprep.subr.bf16.mxu1 %v3330_v51  ;;  %v250_v28 = vld [vmem:[#allocation2 + $0x32] sm:$0xff]  ;;  %v120_v46 = vld [vmem:[#allocation2 + $0x3e] sm:$0xff] }
  0x77   :  { %2749 = vmatprep.subr.bf16.mxu0 %v3330_v51  ;;  %v272_v49 = vadd.f32 %v260_v41, %v236_v22  ;;  %v4126_v40 = vand.u32 4294901760, %v3256_v17  ;;  %v3454_v7 = vsub.f32 %v3262_v21, %v4127_v13  ;;  %v154_v52 = vmul.f32 0.24420135, %v142_v62  ;;  %v143_v10 = vld [vmem:[#allocation2 + $0x37] sm:$0xff] }
  0x78   :  { %4125 = vst [vmem:[#allocation35_spill] sm:$0xff] %v3440_v42  ;;  %v400_v34 = vand.u32 4294901760, %v3440_v42  ;;  %v201_v35 = vadd.f32 %v189_v2, %v165_v20  ;;  %v190_v11 = vmul.f32 0.40261996, %v178_v19  ;;  %v226_v57 = vmul.f32 0.24420135, %v214_v27 }
  0x79   :  { %v3449_v8 = vsub.f32 %v3256_v17, %v4126_v40  ;;  %v3457_v22 = vand.u32 4294901760, %v272_v49  ;;  %v564_v17 = vand.u32 4294901760, %v3454_v7  ;;  %v166_v12 = vadd.f32 %v154_v52, %v130_v44  ;;  %2655 = vmatpush3.bf16.msra.mxu1 %v3330_v51  ;;  %v179_v20 = vld [vmem:[#allocation2 + $0x38] sm:$0xff] }
  0x7a   :  { %2751 = vmatpush3.bf16.msra.mxu0 %v3330_v51  ;;  %v401_v21 = vsub.f32 %v3440_v42, %v400_v34  ;;  %v237_v6 = vadd.f32 %v225_v9, %v201_v35  ;;  %v262_v38 = vmul.f32 0.054488685, %v250_v28  ;;  %v131_v62 = vmul.f32 0.054488685, %v119_v56  ;;  %2657 = vmatprep.subr.bf16.mxu1 %v3380_v0  ;;  %v215_v44 = vld [vmem:[#allocation2 + $0x39] sm:$0xff] }
  0x7b   :  { %v557_v41 = vand.u32 4294901760, %v3449_v8  ;;  %2753 = vmatprep.subr.bf16.mxu0 %v3360_v47  ;;  %v3467_v2 = vsub.f32 %v272_v49, %v3457_v22  ;;  %v565_v19 = vsub.f32 %v3454_v7, %v564_v17  ;;  %v155_v15 = vmul.f32 0.24420135, %v143_v10  ;;  %v251_v28 = vld [vmem:[#allocation2 + $0x3a] sm:$0xff] }
  0x7c   :  { %v402_v40 = vand.u32 4294901760, %v401_v21  ;;  %v273_v13 = vadd.f32 %v261_v45, %v237_v6  ;;  %v202_v9 = vadd.f32 %v190_v11, %v166_v12  ;;  %2357 = vmatmul.mubr.f32.vlgmr.msra.gmra.mrb[0].mxu1 %v392_v53  ;;  %v4128_v56 = vand.u32 4294901760, %v3399_v60 }
  0x7d   :  { %v558_v27 = vsub.f32 %v3449_v8, %v557_v41  ;;  %v3471_v52 = vpack.c.bf16 %v564_v17, %v557_v41  ;;  %v410_v49 = vand.u32 4294901760, %v3467_v2  ;;  %v566_v42 = vand.u32 4294901760, %v565_v19  ;;  %2659 = vmatpush3.bf16.msra.mxu1 %v3380_v0  ;;  %v144_v17 = vld [vmem:[#allocation2 + $0x3f] sm:$0xff] }
  0x7e   :  { %2507 = vmatmul.mubr.f32.vlgmr.msra.gmra.mrb[0].mxu0 %v4128_v56  ;;  %v167_v51 = vadd.f32 %v155_v15, %v131_v62  ;;  %v3478_v10 = vand.u32 4294901760, %v273_v13  ;;  %v238_v45 = vadd.f32 %v226_v57, %v202_v9  ;;  %v191_v41 = vmul.f32 0.40261996, %v179_v20  ;;  %2661 = vmatprep.subr.bf16.mxu1 %v3395_v50  ;;  %v216_v15 = vld [vmem:[#allocation2 + $0x41] sm:$0xff] }
  0x7f   :  { %v559_v35 = vand.u32 4294901760, %v558_v27  ;;  %2755 = vmatpush3.bf16.msra.mxu0 %v3360_v47  ;;  %v227_v11 = vmul.f32 0.24420135, %v215_v44  ;;  %v411_v53 = vsub.f32 %v3467_v2, %v410_v49  ;;  %v263_v21 = vmul.f32 0.054488685, %v251_v28  ;;  %v180_v47 = vld [vmem:[#allocation2 + $0x40] sm:$0xff]  ;;  %2359 = vmatprep.mubr.f32.mxu1 %v402_v40 }
  0x80   :  { %2757 = vmatprep.subr.bf16.mxu0 %v3375_v61  ;;  %v4129_v6 = vand.u32 4294901760, %v3265_v23  ;;  %2509 = vmatprep.mubr.f32.mxu0 %v400_v34  ;;  %v3491_v57 = vsub.f32 %v273_v13, %v3478_v10  ;;  %v274_v62 = vadd.f32 %v262_v38, %v238_v45  ;;  %v203_v27 = vadd.f32 %v191_v41, %v167_v51  ;;  %v252_v28 = vld [vmem:[#allocation2 + $0x42] sm:$0xff] }
  0x81   :  { %v3483_v12 = vpack.c.bf16 %v566_v42, %v559_v35  ;;  %v132_v19 = vmul.f32 0.054488685, %v120_v46  ;;  %v412_v20 = vand.u32 4294901760, %v411_v53  ;;  %v4130_v44 = vand.u32 4294901760, %v3267_v24  ;;  %2663 = vmatpush3.bf16.msra.mxu1 %v3395_v50  ;;  %v145_v41 = vld [vmem:[#allocation2 + $0x47] sm:$0xff] }
  0x82   :  { %v3488_v0 = vsub.f32 %v3265_v23, %v4129_v6  ;;  %2510 = vmatmul.mubr.f32.gmra.mrb[2].mxu0 %v410_v49  ;;  %v156_v23 = vmul.f32 0.24420135, %v144_v17  ;;  %v420_v34 = vand.u32 4294901760, %v3491_v57  ;;  %v3502_v51 = vand.u32 4294901760, %v274_v62  ;;  %2665 = vmatprep.subr.bf16.mxu1 %v3417_v14  ;;  %v121_v49 = vld [vmem:[#allocation2 + $0x46] sm:$0xff] }
  0x83   :  { %v3497_v9 = vsub.f32 %v3267_v24, %v4130_v44  ;;  %2759 = vmatpush3.bf16.msra.mxu0 %v3375_v61  ;;  %v239_v46 = vadd.f32 %v227_v11, %v203_v27  ;;  %v192_v38 = vmul.f32 0.40261996, %v180_v47  ;;  %v228_v56 = vmul.f32 0.24420135, %v216_v15  ;;  %2360 = vmatmul.mubr.f32.gmra.mrb[2].mxu1 %v412_v20  ;;  %v181_v11 = vld [vmem:[#allocation2 + $0x48] sm:$0xff] }
  0x84   :  { %v571_v42 = vand.u32 4294901760, %v3488_v0  ;;  %2761 = vmatprep.subr.bf16.mxu0 %v3393_v48  ;;  %v168_v13 = vadd.f32 %v156_v23, %v132_v19  ;;  %v421_v61 = vsub.f32 %v3491_v57, %v420_v34  ;;  %2512 = vmatprep.mubr.f32.mxu0 %v420_v34  ;;  %v3510_v50 = vsub.f32 %v274_v62, %v3502_v51  ;;  %v217_v27 = vld [vmem:[#allocation2 + $0x49] sm:$0xff] }
  0x85   :  { %v578_v24 = vand.u32 4294901760, %v3497_v9  ;;  %v275_v35 = vadd.f32 %v263_v21, %v239_v46  ;;  %v264_v45 = vmul.f32 0.054488685, %v252_v28  ;;  %v253_v19 = vld [vmem:[#allocation2 + $0x4a] sm:$0xff]  ;;  %2667 = vmatpush3.bf16.msra.mxu1 %v3417_v14  ;;  %v133_v21 = vmul.f32 0.054488685, %v121_v49 }
  0x86   :  { %v572_v40 = vsub.f32 %v3488_v0, %v571_v42  ;;  %v204_v47 = vadd.f32 %v192_v38, %v168_v13  ;;  %v422_v15 = vand.u32 4294901760, %v421_v61  ;;  %v430_v62 = vand.u32 4294901760, %v3510_v50  ;;  %2669 = vmatprep.subr.bf16.mxu1 %v3442_v16  ;;  %v122_v34 = vld [vmem:[#allocation2 + $0x4e] sm:$0xff] }
  0x87   :  { %v579_v53 = vsub.f32 %v3497_v9, %v578_v24  ;;  %v3513_v6 = vpack.c.bf16 %v578_v24, %v571_v42  ;;  %2763 = vmatpush3.bf16.msra.mxu0 %v3393_v48  ;;  %v3518_v20 = vand.u32 4294901760, %v275_v35  ;;  %v157_v23 = vmul.f32 0.24420135, %v145_v41  ;;  %v182_v41 = vld [vmem:[#allocation2 + $0x50] sm:$0xff] }
  0x88   :  { %v573_v17 = vand.u32 4294901760, %v572_v40  ;;  %2765 = vmatprep.subr.bf16.mxu0 %v3433_v4  ;;  %v240_v42 = vadd.f32 %v228_v56, %v204_v47  ;;  %v193_v28 = vmul.f32 0.40261996, %v181_v11  ;;  %2362 = vmatprep.mubr.f32.mxu1 %v422_v15  ;;  %v431_v14 = vsub.f32 %v3510_v50, %v430_v62  ;;  %v146_v40 = vld [vmem:[#allocation2 + $0x4f] sm:$0xff] }
  0x89   :  { %v580_v44 = vand.u32 4294901760, %v579_v53  ;;  %2513 = vmatmul.mubr.f32.gmra.mrb[4].mxu0 %v430_v62  ;;  %v3524_v48 = vsub.f32 %v275_v35, %v3518_v20  ;;  %v229_v46 = vmul.f32 0.24420135, %v217_v27  ;;  %v265_v38 = vmul.f32 0.054488685, %v253_v19  ;;  %v218_v11 = vld [vmem:[#allocation2 + $0x51] sm:$0xff]  ;;  %2671 = vmatpush3.bf16.msra.mxu1 %v3442_v16 }
  0x8a   :  { %v276_v13 = vadd.f32 %v264_v45, %v240_v42  ;;  %v169_v49 = vadd.f32 %v157_v23, %v133_v21  ;;  %v4131_v61 = vand.u32 4294901760, %v3283_v29  ;;  %v432_v53 = vand.u32 4294901760, %v431_v14  ;;  %2673 = vmatprep.subr.bf16.mxu1 %v3483_v12  ;;  %v147_v14 = vld [vmem:[#allocation2 + $0x57] sm:$0xff] }
  0x8b   :  { %v2676_v24 = vpack.c.bf16 %v580_v44, %v573_v17  ;;  %2767 = vmatpush3.bf16.msra.mxu0 %v3433_v4  ;;  %v440_v35 = vand.u32 4294901760, %v3524_v48  ;;  %v4132_v47 = vand.u32 4294901760, %v3285_v30  ;;  %v134_v45 = vmul.f32 0.054488685, %v122_v34  ;;  %v254_v4 = vld [vmem:[#allocation2 + $0x52] sm:$0xff] }
  0x8c   :  { %v3529_v56 = vsub.f32 %v3283_v29, %v4131_v61  ;;  %2769 = vmatprep.subr.bf16.mxu0 %v3471_v52  ;;  %v3541_v29 = vand.u32 4294901760, %v276_v13  ;;  %v205_v27 = vadd.f32 %v193_v28, %v169_v49  ;;  %v158_v19 = vmul.f32 0.24420135, %v146_v40  ;;  %2363 = vmatmul.mubr.f32.gmra.mrb[4].mxu1 %v432_v53  ;;  %v123_v28 = vld [vmem:[#allocation2 + $0x56] sm:$0xff] }
  0x8d   :  { %v3537_v17 = vsub.f32 %v3285_v30, %v4132_v47  ;;  %v441_v15 = vsub.f32 %v3524_v48, %v440_v35  ;;  %2515 = vmatprep.mubr.f32.mxu0 %v440_v35  ;;  %v194_v30 = vmul.f32 0.40261996, %v182_v41  ;;  %v230_v21 = vmul.f32 0.24420135, %v218_v11  ;;  %2675 = vmatpush3.bf16.msra.mxu1 %v3483_v12  ;;  %v183_v41 = vld [vmem:[#allocation2 + $0x58] sm:$0xff] }
  0x8e   :  { %v585_v16 = vand.u32 4294901760, %v3529_v56  ;;  %v3547_v44 = vsub.f32 %v276_v13, %v3541_v29  ;;  %v241_v42 = vadd.f32 %v229_v46, %v205_v27  ;;  %v170_v34 = vadd.f32 %v158_v19, %v134_v45  ;;  %2677 = vmatprep.subr.bf16.mxu1 %v2676_v24  ;;  %v219_v47 = vld [vmem:[#allocation2 + $0x59] sm:$0xff] }
  0x8f   :  { %v592_v62 = vand.u32 4294901760, %v3537_v17  ;;  %2771 = vmatpush3.bf16.msra.mxu0 %v3471_v52  ;;  %v442_v40 = vand.u32 4294901760, %v441_v15  ;;  %v266_v53 = vmul.f32 0.054488685, %v254_v4  ;;  %v255_v45 = vld [vmem:[#allocation2 + $0x5a] sm:$0xff]  ;;  %v4133_v19 = vand.u32 4294901760, %v3287_v31 }
  0x90   :  { %v586_v23 = vsub.f32 %v3529_v56, %v585_v16  ;;  %2773 = vmatprep.subr.bf16.mxu0 %v3513_v6  ;;  %v450_v46 = vand.u32 4294901760, %v3547_v44  ;;  %v277_v13 = vadd.f32 %v265_v38, %v241_v42  ;;  %v206_v35 = vadd.f32 %v194_v30, %v170_v34  ;;  %v124_v42 = vld [vmem:[#allocation2 + $0x5e] sm:$0xff] }
  0x91   :  { %v593_v49 = vsub.f32 %v3537_v17, %v592_v62  ;;  %v2776_v61 = vpack.c.bf16 %v592_v62, %v585_v16  ;;  %2365 = vmatprep.mubr.f32.mxu1 %v442_v40  ;;  %v135_v27 = vmul.f32 0.054488685, %v123_v28  ;;  %v159_v52 = vmul.f32 0.24420135, %v147_v14  ;;  %v148_v30 = vld [vmem:[#allocation2 + $0x5f] sm:$0xff]  ;;  %2679 = vmatpush3.bf16.msra.mxu1 %v2676_v24 }
  0x92   :  { %v587_v11 = vand.u32 4294901760, %v586_v23  ;;  %v3558_v16 = vsub.f32 %v3287_v31, %v4133_v19  ;;  %v451_v4 = vsub.f32 %v3547_v44, %v450_v46  ;;  %2516 = vmatmul.mubr.f32.gmra.mrb[6].mxu0 %v450_v46  ;;  %v3561_v15 = vand.u32 4294901760, %v277_v13  ;;  %v184_v40 = vld [vmem:[#allocation2 + $0x60] sm:$0xff] }
  0x93   :  { %v594_v12 = vand.u32 4294901760, %v593_v49  ;;  %v242_v62 = vadd.f32 %v230_v21, %v206_v35  ;;  %v195_v38 = vmul.f32 0.40261996, %v183_v41  ;;  %2775 = vmatpush3.bf16.msra.mxu0 %v3513_v6  ;;  %v171_v34 = vadd.f32 %v159_v52, %v135_v27  ;;  %v220_v21 = vld [vmem:[#allocation2 + $0x61] sm:$0xff] }
  0x94   :  { %v231_v28 = vmul.f32 0.24420135, %v219_v47  ;;  %v267_v14 = vmul.f32 0.054488685, %v255_v45  ;;  %v452_v49 = vand.u32 4294901760, %v451_v4  ;;  %v3565_v31 = vsub.f32 %v277_v13, %v3561_v15  ;;  %2777 = vmatprep.subr.bf16.mxu0 %v2776_v61  ;;  %v256_v47 = vld [vmem:[#allocation2 + $0x62] sm:$0xff] }
  0x95   :  { %v2680_v23 = vpack.c.bf16 %v594_v12, %v587_v11  ;;  %v278_v46 = vadd.f32 %v266_v53, %v242_v62  ;;  %v599_v19 = vand.u32 4294901760, %v3558_v16  ;;  %v207_v41 = vadd.f32 %v195_v38, %v171_v34 }
  0x96   :  { %v4134_v24 = vand.u32 4294901760, %v3300_v36  ;;  %v136_v11 = vmul.f32 0.054488685, %v124_v42  ;;  %v160_v35 = vmul.f32 0.24420135, %v148_v30  ;;  %2366 = vmatmul.mubr.f32.gmra.mrb[6].mxu1 %v452_v49  ;;  %v460_v45 = vand.u32 4294901760, %v3565_v31 }
  0x97   :  { %2681 = vmatprep.subr.bf16.mxu1 %v2680_v23  ;;  %v3574_v13 = vand.u32 4294901760, %v278_v46  ;;  %v600_v53 = vsub.f32 %v3558_v16, %v599_v19  ;;  %v196_v12 = vmul.f32 0.40261996, %v184_v40  ;;  %2779 = vmatpush3.bf16.msra.mxu0 %v2776_v61  ;;  %v243_v27 = vadd.f32 %v231_v28, %v207_v41 }
  0x98   :  { %v3571_v6 = vsub.f32 %v3300_v36, %v4134_v24  ;;  %2683 = vmatpush3.bf16.msra.mxu1 %v2680_v23  ;;  %v172_v4 = vadd.f32 %v160_v35, %v136_v11  ;;  %v232_v62 = vmul.f32 0.24420135, %v220_v21  ;;  %v461_v36 = vsub.f32 %v3565_v31, %v460_v45  ;;  %2518 = vmatprep.mubr.f32.mxu0 %v460_v45 }
  0x99   :  { %v3580_v38 = vsub.f32 %v278_v46, %v3574_v13  ;;  %v601_v42 = vand.u32 4294901760, %v600_v53  ;;  %v268_v30 = vmul.f32 0.054488685, %v256_v47  ;;  %v279_v34 = vadd.f32 %v267_v14, %v243_v27 }
  0x9a   :  { %v606_v52 = vand.u32 4294901760, %v3571_v6  ;;  %v208_v40 = vadd.f32 %v196_v12, %v172_v4  ;;  %v462_v23 = vand.u32 4294901760, %v461_v36  ;;  %v2688_v47 = vpack.c.bf16 %v3334_v58, %v3332_v54 }
  0x9b   :  { %v470_v61 = vand.u32 4294901760, %v3580_v38  ;;  %v3584_v28 = vand.u32 4294901760, %v279_v34  ;;  %v2696_v36 = vpack.c.bf16 %v3372_v55, %v3357_v5  ;;  %v4137_v5 = vld [vmem:[#allocation33_spill] sm:$0xff]  ;;  %v4138_v55 = vld [vmem:[#allocation34_spill] sm:$0xff] }
  0x9c   :  { %v607_v49 = vsub.f32 %v3571_v6, %v606_v52  ;;  %v2780_v24 = vpack.c.bf16 %v606_v52, %v599_v19  ;;  %v244_v21 = vadd.f32 %v232_v62, %v208_v40  ;;  %2368 = vmatprep.mubr.f32.mxu1 %v462_v23  ;;  %v2692_v62 = vpack.c.bf16 %v3352_v43, %v3342_v3  ;;  %v4136_v3 = vld [vmem:[#allocation32_spill] sm:$0xff] }
  0x9d   :  { %v471_v11 = vsub.f32 %v3580_v38, %v470_v61  ;;  %2519 = vmatmul.mubr.f32.gmra.mrb[8].mxu0 %v470_v61  ;;  %v3588_v46 = vsub.f32 %v279_v34, %v3584_v28  ;;  %v2716_v43 = vpack.c.bf16 %v3571_v6, %v3558_v16 }
  0x9e   :  { %v608_v41 = vand.u32 4294901760, %v607_v49  ;;  %2781 = vmatprep.subr.bf16.mxu0 %v2780_v24  ;;  %v280_v35 = vadd.f32 %v268_v30, %v244_v21 }
  0x9f   :  { %2783 = vmatpush3.bf16.msra.mxu0 %v2780_v24  ;;  %v472_v19 = vand.u32 4294901760, %v471_v11  ;;  %v480_v45 = vand.u32 4294901760, %v3588_v46 }
  0xa0   :  { %v2684_v14 = vpack.c.bf16 %v608_v41, %v601_v42  ;;  %2785 = vmatprep.subr.bf16.mxu0 %v3258_v18  ;;  %v3594_v53 = vand.u32 4294901760, %v280_v35 }
  0xa1   :  { %2369 = vmatmul.mubr.f32.gmra.mrb[8].mxu1 %v472_v19  ;;  %v481_v12 = vsub.f32 %v3588_v46, %v480_v45  ;;  %2521 = vmatprep.mubr.f32.mxu0 %v480_v45 }
  0xa2   :  { %2685 = vmatprep.subr.bf16.mxu1 %v2684_v14  ;;  %v3598_v27 = vsub.f32 %v280_v35, %v3594_v53 }
  0xa3   :  { %2687 = vmatpush3.bf16.msra.mxu1 %v2684_v14  ;;  %v482_v52 = vand.u32 4294901760, %v481_v12 }
  0xa4   :  { %2689 = vmatprep.subr.bf16.mxu1 %v2688_v47  ;;  %v490_v4 = vand.u32 4294901760, %v3598_v27 }
  0xa5   :  { %2371 = vmatprep.mubr.f32.mxu1 %v482_v52 }
  0xa6   :  { %v491_v54 = vsub.f32 %v3598_v27, %v490_v4  ;;  %2522 = vmatmul.mubr.f32.gmra.mrb[10].mxu0 %v490_v4 }
  0xa7   :  { %2556 = vmatprep.mubr.f32.mxu0 %v3378_v63 }
  0xa8   :  { %v492_v58 = vand.u32 4294901760, %v491_v54 }
  0xaa   :  { %2372 = vmatmul.mubr.f32.gmra.mrb[10].mxu1 %v492_v58  ;;  %2557 = vmatmul.mubr.f32.vlgmr.msra.gmra.mrb[0].mxu0 %v3390_v37 }
  0xab   :  { %2406 = vmatprep.mubr.f32.mxu1 %v3378_v63  ;;  %2787 = vmatpush3.bf16.msra.mxu0 %v3258_v18  ;;  %v2700_v18 = vpack.c.bf16 %v3411_v1, %v3406_v59 }
  0xac   :  { %2789 = vmatprep.subr.bf16.mxu0 %v3273_v25  ;;  %2559 = vmatprep.mubr.f32.mxu0 %v3435_v33 }
  0xae   :  { %2407 = vmatmul.mubr.f32.vlgmr.msra.gmra.mrb[0].mxu1 %v3390_v37  ;;  %2560 = vmatmul.mubr.f32.gmra.mrb[2].mxu0 %v3457_v22 }
  0xaf   :  { %2691 = vmatpush3.bf16.msra.mxu1 %v2688_v47  ;;  %2791 = vmatpush3.bf16.msra.mxu0 %v3273_v25  ;;  %v2704_v25 = vpack.c.bf16 %v3454_v7, %v3449_v8 }
  0xb0   :  { %2693 = vmatprep.subr.bf16.mxu1 %v2692_v62  ;;  %2793 = vmatprep.subr.bf16.mxu0 %v3279_v26 }
  0xb1   :  { %2409 = vmatprep.mubr.f32.mxu1 %v3435_v33  ;;  %2562 = vmatprep.mubr.f32.mxu0 %v3478_v10 }
  0xb2   :  { %2410 = vmatmul.mubr.f32.gmra.mrb[2].mxu1 %v3457_v22  ;;  %2563 = vmatmul.mubr.f32.gmra.mrb[4].mxu0 %v3502_v51 }
  0xb3   :  { %2695 = vmatpush3.bf16.msra.mxu1 %v2692_v62  ;;  %2795 = vmatpush3.bf16.msra.mxu0 %v3279_v26  ;;  %v2708_v26 = vpack.c.bf16 %v3497_v9, %v3488_v0 }
  0xb4   :  { %2697 = vmatprep.subr.bf16.mxu1 %v2696_v36  ;;  %2797 = vmatprep.subr.bf16.mxu0 %v3295_v32 }
  0xb5   :  { %2412 = vmatprep.mubr.f32.mxu1 %v3478_v10  ;;  %2565 = vmatprep.mubr.f32.mxu0 %v3518_v20 }
  0xb6   :  { %2413 = vmatmul.mubr.f32.gmra.mrb[4].mxu1 %v3502_v51  ;;  %2566 = vmatmul.mubr.f32.gmra.mrb[6].mxu0 %v3541_v29 }
  0xb7   :  { %2699 = vmatpush3.bf16.msra.mxu1 %v2696_v36  ;;  %2799 = vmatpush3.bf16.msra.mxu0 %v3295_v32  ;;  %v4135_v32 = vld [vmem:[#allocation31_spill] sm:$0xff] }
  0xb8   :  { %2701 = vmatprep.subr.bf16.mxu1 %v2700_v18  ;;  %2801 = vmatprep.subr.bf16.mxu0 %v3308_v39 }
  0xb9   :  { %2415 = vmatprep.mubr.f32.mxu1 %v3518_v20  ;;  %2568 = vmatprep.mubr.f32.mxu0 %v3561_v15 }
  0xba   :  { %2416 = vmatmul.mubr.f32.gmra.mrb[6].mxu1 %v3541_v29  ;;  %2569 = vmatmul.mubr.f32.gmra.mrb[8].mxu0 %v3574_v13 }
  0xbb   :  { %2703 = vmatpush3.bf16.msra.mxu1 %v2700_v18  ;;  %2803 = vmatpush3.bf16.msra.mxu0 %v3308_v39  ;;  %v2712_v39 = vpack.c.bf16 %v3537_v17, %v3529_v56 }
  0xbc   :  { %2705 = vmatprep.subr.bf16.mxu1 %v2704_v25  ;;  %2805 = vmatprep.subr.bf16.mxu0 %v4135_v32 }
  0xbd   :  { %2418 = vmatprep.mubr.f32.mxu1 %v3561_v15  ;;  %2571 = vmatprep.mubr.f32.mxu0 %v3584_v28 }
  0xbe   :  { %2419 = vmatmul.mubr.f32.gmra.mrb[8].mxu1 %v3574_v13  ;;  %2572 = vmatmul.mubr.f32.gmra.mrb[10].mxu0 %v3594_v53 }
  0xbf   :  { %2707 = vmatpush3.bf16.msra.mxu1 %v2704_v25  ;;  %2807 = vmatpush3.bf16.msra.mxu0 %v4135_v32 }
  0xc0   :  { %2709 = vmatprep.subr.bf16.mxu1 %v2708_v26  ;;  %2809 = vmatprep.subr.bf16.mxu0 %v4136_v3 }
  0xc1   :  { %2421 = vmatprep.mubr.f32.mxu1 %v3584_v28  ;;  %2606 = vmatprep.mubr.f32.mxu0 %v3378_v63  ;;  %v4139_v63 = vld [vmem:[#allocation35_spill] sm:$0xff] }
  0xc2   :  { %2422 = vmatmul.mubr.f32.gmra.mrb[10].mxu1 %v3594_v53 }
  0xc3   :  { %2711 = vmatpush3.bf16.msra.mxu1 %v2708_v26  ;;  %2811 = vmatpush3.bf16.msra.mxu0 %v4136_v3 }
  0xc4   :  { %2713 = vmatprep.subr.bf16.mxu1 %v2712_v39  ;;  %2813 = vmatprep.subr.bf16.mxu0 %v4137_v5 }
  0xc5   :  { %2456 = vmatprep.mubr.f32.mxu1 %v4138_v55 }
  0xc7   :  { %2715 = vmatpush3.bf16.msra.mxu1 %v2712_v39  ;;  %2815 = vmatpush3.bf16.msra.mxu0 %v4137_v5 }
  0xc8   :  { %2717 = vmatprep.subr.bf16.mxu1 %v2716_v43 }
  0xca   :  { %2607 = vmatmul.mubr.f32.vlgmr.msra.gmra.mrb[0].mxu0 %v3390_v37 }
  0xcb   :  { %2719 = vmatpush3.bf16.msra.mxu1 %v2716_v43  ;;  %2609 = vmatprep.mubr.f32.mxu0 %v3435_v33 }
  0xce   :  { %2457 = vmatmul.mubr.f32.vlgmr.msra.gmra.mrb[0].mxu1 %v3399_v60  ;;  %2610 = vmatmul.mubr.f32.gmra.mrb[2].mxu0 %v3457_v22 }
  0xcf   :  { %2459 = vmatprep.mubr.f32.mxu1 %v4139_v63  ;;  %2612 = vmatprep.mubr.f32.mxu0 %v3478_v10 }
  0xd2   :  { %2460 = vmatmul.mubr.f32.gmra.mrb[2].mxu1 %v3467_v2  ;;  %2613 = vmatmul.mubr.f32.gmra.mrb[4].mxu0 %v3502_v51 }
  0xd3   :  { %2462 = vmatprep.mubr.f32.mxu1 %v3491_v57  ;;  %2615 = vmatprep.mubr.f32.mxu0 %v3518_v20 }
  0xd6   :  { %2463 = vmatmul.mubr.f32.gmra.mrb[4].mxu1 %v3510_v50  ;;  %2616 = vmatmul.mubr.f32.gmra.mrb[6].mxu0 %v3541_v29 }
  0xd7   :  { %2465 = vmatprep.mubr.f32.mxu1 %v3524_v48  ;;  %2618 = vmatprep.mubr.f32.mxu0 %v3561_v15 }
  0xda   :  { %2466 = vmatmul.mubr.f32.gmra.mrb[6].mxu1 %v3547_v44  ;;  %2619 = vmatmul.mubr.f32.gmra.mrb[8].mxu0 %v3574_v13 }
  0xdb   :  { %2468 = vmatprep.mubr.f32.mxu1 %v3565_v31  ;;  %2621 = vmatprep.mubr.f32.mxu0 %v3584_v28 }
  0xde   :  { %2469 = vmatmul.mubr.f32.gmra.mrb[8].mxu1 %v3580_v38  ;;  %2622 = vmatmul.mubr.f32.gmra.mrb[10].mxu0 %v3594_v53 }
  0xdf   :  { %2471 = vmatprep.mubr.f32.mxu1 %v3588_v46 }
  0xe2   :  { %2472 = vmatmul.mubr.f32.gmra.mrb[10].mxu1 %v3598_v27 }
 0x19d   :  { %v2608_v33 = vpop.f32.mrb[0].mxu0 }
 0x19e   :  { %v1341_v37 = vpop.f32.mrb[1].mxu0 }
 0x1a1   :  { %v2458_v60 = vpop.f32.mrb[0].mxu1  ;;  %v2611_v59 = vpop.f32.mrb[2].mxu0 }
 0x1a2   :  { %v2816_v1 = vadd.f32 %v2608_v33, %v2458_v60  ;;  %v815_v8 = vpop.f32.mrb[1].mxu1  ;;  %v1353_v7 = vpop.f32.mrb[3].mxu0 }
 0x1a4   :  { %1416 = vst [vmem:[#allocation3 + $0x10] sm:$0xff] %v2816_v1  ;;  %1419 = vst [vmem:[#allocation9] sm:$0xff] %v2816_v1  ;;  %v1480_v41 = vmul.f32 2.0, %v2816_v1 }
 0x1a5   :  { %v2461_v22 = vpop.f32.mrb[2].mxu1  ;;  %v2614_v2 = vpop.f32.mrb[4].mxu0 }
 0x1a6   :  { %v829_v10 = vpop.f32.mrb[3].mxu1  ;;  %v1365_v0 = vpop.f32.mrb[5].mxu0 }
 0x1a7   :  { %v2817_v57 = vadd.f32 %v1353_v7, %v829_v10 }
 0x1a9   :  { %1417 = vst [vmem:[#allocation3 + $0x18] sm:$0xff] %v2817_v57  ;;  %1420 = vst [vmem:[#allocation9 + $0x8] sm:$0xff] %v2817_v57  ;;  %v2464_v9 = vpop.f32.mrb[4].mxu1  ;;  %v2617_v51 = vpop.f32.mrb[6].mxu0  ;;  %v1481_v31 = vmul.f32 2.0, %v2817_v57  ;;  %v4140_v57 = vld [vmem:[#allocation30_spill] sm:$0xff] }
 0x1aa   :  { %v2818_v50 = vadd.f32 %v2614_v2, %v2464_v9  ;;  %v843_v20 = vpop.f32.mrb[5].mxu1  ;;  %v1377_v48 = vpop.f32.mrb[7].mxu0  ;;  %v3727_v2 = vld [vmem:[#allocation3 + $0x8] sm:$0xff]  ;;  %vm1563_vm0 = vcmp.ge.s32.totalorder %v4140_v57, 1  ;;  %vm1600_vm1 = vcmp.lt.s32.totalorder %v4140_v57, 15 }
 0x1ab   :  { %v1444_v15 = vld [vmem:[#allocation3 + $0xf] sm:$0xff] }
 0x1ac   :  { %1426 = vst [vmem:[#allocation3 + $0x30] sm:$0xff] %v2818_v50  ;;  %1430 = vst [vmem:[#allocation9 + $0x10] sm:$0xff] %v2818_v50  ;;  %v1492_v14 = vadd.f32 %v1480_v41, %v1444_v15  ;;  %v1484_v54 = vmul.f32 2.0, %v2818_v50 }
 0x1ad   :  { %v2467_v56 = vpop.f32.mrb[6].mxu1  ;;  %v2620_v17 = vpop.f32.mrb[8].mxu0 }
 0x1ae   :  { %v857_v29 = vpop.f32.mrb[7].mxu1  ;;  %v1389_v44 = vpop.f32.mrb[9].mxu0 }
 0x1af   :  { %v2819_v16 = vadd.f32 %v1377_v48, %v857_v29 }
 0x1b0   :  { %v1468_v6 = vld [vmem:[#allocation3 + $0x11] sm:$0xff]  ;;  %v1469_v38 = vld [vmem:[#allocation3 + $0x19] sm:$0xff] }
 0x1b1   :  { %v1445_v13 = vld [vmem:[#allocation3 + $0x17] sm:$0xff]  ;;  %1427 = vst [vmem:[#allocation3 + $0x38] sm:$0xff] %v2819_v16  ;;  %1431 = vst [vmem:[#allocation9 + $0x18] sm:$0xff] %v2819_v16  ;;  %v2470_v42 = vpop.f32.mrb[8].mxu1  ;;  %v3679_v30 = vsub.f32 %v1444_v15, %v1468_v6  ;;  %v2623_v24 = vpop.f32.mrb[10].mxu0  ;;  %v1504_v19 = vadd.f32 %v1492_v14, %v1468_v6  ;;  %v1485_v4 = vmul.f32 2.0, %v2819_v16 }
 0x1b2   :  { %v3681_v34 = vsub.f32 %v1445_v13, %v1469_v38  ;;  %v1493_v49 = vadd.f32 %v1481_v31, %v1445_v13  ;;  %v2820_v40 = vadd.f32 %v2620_v17, %v2470_v42  ;;  %v871_v23 = vpop.f32.mrb[9].mxu1  ;;  %v1401_v61 = vpop.f32.mrb[11].mxu0 }
 0x1b3   :  { %1627 = vrot.lane.b32.xlu0 %v3679_v30, %s3103_s0  ;;  %v1448_v45 = vld [vmem:[#allocation3 + $0x2f] sm:$0xff]  ;;  %v1516_v53 = vmul.f32 0.125, %v1504_v19  ;;  %v1662_v29 = vmul.f32 2.0, %v3679_v30 }
 0x1b4   :  { %1689 = vrot.lane.b32.xlu1 %v3681_v34, %s3104_s9  ;;  %v1505_v28 = vadd.f32 %v1493_v49, %v1469_v38  ;;  %1437 = vst [vmem:[#allocation3 + $0x50] sm:$0xff] %v2820_v40  ;;  %1441 = vst [vmem:[#allocation9 + $0x20] sm:$0xff] %v2820_v40  ;;  %v1496_v36 = vadd.f32 %v1484_v54, %v1448_v45  ;;  %v1488_v63 = vmul.f32 2.0, %v2820_v40  ;;  %v1663_v51 = vmul.f32 2.0, %v3681_v34 }
 0x1b5   :  { %v2473_v21 = vpop.f32.mrb[10].mxu1 }
 0x1b6   :  { %v1517_v11 = vmul.f32 0.125, %v1505_v28  ;;  %v885_v46 = vpop.f32.mrb[11].mxu1 }
 0x1b7   :  { %v2821_v35 = vadd.f32 %v1401_v61, %v885_v46  ;;  %1629 = vrot.lane.b32.xlu0 %v3681_v34, %s3103_s0 }
 0x1b8   :  { %1543 = vrot.lane.b32.xlu1 %v1517_v11, %s3103_s0  ;;  %v1472_v47 = vld [vmem:[#allocation3 + $0x31] sm:$0xff]  ;;  %v1473_v52 = vld [vmem:[#allocation3 + $0x39] sm:$0xff] }
 0x1b9   :  { %1438 = vst [vmem:[#allocation3 + $0x58] sm:$0xff] %v2821_v35  ;;  %1442 = vst [vmem:[#allocation9 + $0x28] sm:$0xff] %v2821_v35  ;;  %v3693_v12 = vsub.f32 %v1448_v45, %v1472_v47  ;;  %v1449_v27 = vld [vmem:[#allocation3 + $0x37] sm:$0xff]  ;;  %v1508_v18 = vadd.f32 %v1496_v36, %v1472_v47  ;;  %v1489_v5 = vmul.f32 2.0, %v2821_v35 }
 0x1ba   :  { %v3698_v58 = vsub.f32 %v1449_v27, %v1473_v52  ;;  %v1497_v62 = vadd.f32 %v1485_v4, %v1449_v27 }
 0x1bb   :  { %1687 = vrot.lane.b32.xlu0 %v3679_v30, %s3104_s9  ;;  %v1520_v26 = vmul.f32 0.125, %v1508_v18  ;;  %v1452_v55 = vld [vmem:[#allocation3 + $0x4f] sm:$0xff]  ;;  %v1666_v35 = vmul.f32 2.0, %v3693_v12 }
 0x1bc   :  { %1580 = vrot.lane.b32.xlu1 %v1517_v11, %s3104_s9  ;;  %v1509_v25 = vadd.f32 %v1497_v62, %v1473_v52  ;;  %v1500_v59 = vadd.f32 %v1488_v63, %v1452_v55  ;;  %v1667_v47 = vmul.f32 2.0, %v3698_v58 }
 0x1be   :  { %v1521_v32 = vmul.f32 0.125, %v1509_v25 }
 0x1bf   :  { %1541 = vrot.lane.b32.xlu0 %v1516_v53, %s3103_s0 }
 0x1c0   :  { %1635 = vrot.lane.b32.xlu1 %v3693_v12, %s3103_s0  ;;  %v1476_v39 = vld [vmem:[#allocation3 + $0x51] sm:$0xff]  ;;  %v1477_v43 = vld [vmem:[#allocation3 + $0x59] sm:$0xff] }
 0x1c1   :  { %v1453_v3 = vld [vmem:[#allocation3 + $0x57] sm:$0xff]  ;;  %v3711_v33 = vsub.f32 %v1452_v55, %v1476_v39  ;;  %v1512_v1 = vadd.f32 %v1500_v59, %v1476_v39 }
 0x1c2   :  { %v3713_v37 = vsub.f32 %v1453_v3, %v1477_v43  ;;  %v1501_v60 = vadd.f32 %v1489_v5, %v1453_v3 }
 0x1c3   :  { %1578 = vrot.lane.b32.xlu0 %v1516_v53, %s3104_s9  ;;  %v1524_v7 = vmul.f32 0.125, %v1512_v1 }
 0x1c4   :  { %1637 = vrot.lane.b32.xlu1 %v3698_v58, %s3103_s0  ;;  %v1513_v8 = vadd.f32 %v1501_v60, %v1477_v43 }
 0x1c6   :  { %v1525_v22 = vmul.f32 0.125, %v1513_v8 }
 0x1c7   :  { %1695 = vrot.lane.b32.xlu0 %v3693_v12, %s3104_s9 }
 0x1c8   :  { %1697 = vrot.lane.b32.xlu1 %v3698_v58, %s3104_s9 }
 0x1cb   :  { %1549 = vrot.lane.b32.xlu0 %v1520_v26, %s3103_s0 }
 0x1cc   :  { %1551 = vrot.lane.b32.xlu1 %v1521_v32, %s3103_s0 }
 0x1cf   :  { %1586 = vrot.lane.b32.xlu0 %v1520_v26, %s3104_s9 }
 0x1d0   :  { %1588 = vrot.lane.b32.xlu1 %v1521_v32, %s3104_s9 }
 0x1d3   :  { %1643 = vrot.lane.b32.xlu0 %v3711_v33, %s3103_s0 }
 0x1d4   :  { %1645 = vrot.lane.b32.xlu1 %v3713_v37, %s3103_s0 }
 0x1d7   :  { %1703 = vrot.lane.b32.xlu0 %v3711_v33, %s3104_s9 }
 0x1d8   :  { %1705 = vrot.lane.b32.xlu1 %v3713_v37, %s3104_s9 }
 0x1db   :  { %1557 = vrot.lane.b32.xlu0 %v1524_v7, %s3103_s0 }
 0x1dc   :  { %1559 = vrot.lane.b32.xlu1 %v1525_v22, %s3103_s0 }
 0x1df   :  { %1594 = vrot.lane.b32.xlu0 %v1524_v7, %s3104_s9 }
 0x1e0   :  { %1596 = vrot.lane.b32.xlu1 %v1525_v22, %s3104_s9 }
 0x1e3   :  { %1895 = vrot.lane.b32.xlu0 %v3727_v2, %s3104_s9 }
 0x225   :  { %v1628_v10 = vpop.permute.xlu0 %1627 }
 0x226   :  { %v1690_v0 = vpop.permute.xlu1 %1689  ;;  %v1650_v56 = vsel %vm1563_vm0, %v1628_v10, 0.0 }
 0x227   :  { %v1711_v17 = vsel %vm1600_vm1, %v1690_v0, 0.0  ;;  %v1674_v13 = vadd.f32 %v1662_v29, %v1650_v56 }
 0x229   :  { %v1630_v9 = vpop.permute.xlu0 %1629 }
 0x22a   :  { %v1544_v50 = vpop.permute.xlu1 %1543  ;;  %v1651_v20 = vsel %vm1563_vm0, %v1630_v9, 0.0 }
 0x22b   :  { %v1675_v48 = vadd.f32 %v1663_v51, %v1651_v20  ;;  %v1566_v38 = vsel %vm1563_vm0, %v1544_v50, 0.0 }
 0x22d   :  { %v1723_v44 = vadd.f32 %v1711_v17, %v1675_v48  ;;  %v1688_v16 = vpop.permute.xlu0 %1687 }
 0x22e   :  { %v1581_v15 = vpop.permute.xlu1 %1580  ;;  %v1710_v31 = vsel %vm1600_vm1, %v1688_v16, 0.0  ;;  %v1670_v16 = vmul.f32 2.0, %v3711_v33 }
 0x22f   :  { %v1603_v6 = vsel %vm1600_vm1, %v1581_v15, 0.0  ;;  %v1735_v42 = vmul.f32 0.125, %v1723_v44  ;;  %v1722_v34 = vadd.f32 %v1710_v31, %v1674_v13  ;;  %v1671_v15 = vmul.f32 2.0, %v3713_v37 }
 0x230   :  { %v3747_v49 = vsub.f32 %v1566_v38, %v1603_v6 }
 0x231   :  { %v1542_v24 = vpop.permute.xlu0 %1541  ;;  %v1759_v30 = vmul.f32 %v1735_v42, %v1735_v42  ;;  %v1734_v23 = vmul.f32 0.125, %v1722_v34 }
 0x232   :  { %v1636_v40 = vpop.permute.xlu1 %1635  ;;  %v1755_v61 = vmul.f32 %v3747_v49, %v3747_v49  ;;  %v1565_v21 = vsel %vm1563_vm0, %v1542_v24, 0.0 }
 0x233   :  { %v1654_v11 = vsel %vm1563_vm0, %v1636_v40, 0.0  ;;  %v1758_v54 = vmul.f32 %v1734_v23, %v1734_v23 }
 0x234   :  { %v1678_v45 = vadd.f32 %v1666_v35, %v1654_v11  ;;  %v3765_v62 = vadd.f32 %v1759_v30, %v1755_v61 }
 0x235   :  { %v1579_v28 = vpop.permute.xlu0 %1578 }
 0x236   :  { %v1638_v41 = vpop.permute.xlu1 %1637  ;;  %v1602_v46 = vsel %vm1600_vm1, %v1579_v28, 0.0  ;;  %2886 = vrsqrt.f32 %v3765_v62  ;;  %vm1781_vm2 = vcmp.eq.f32.partialorder %v3765_v62, inf  ;;  %v1784_v11 = vand.u32 2147483648, %v3765_v62 }
 0x237   :  { %v1655_v14 = vsel %vm1563_vm0, %v1638_v41, 0.0  ;;  %v3760_v19 = vsub.f32 %v1565_v21, %v1602_v46  ;;  %vm1783_vm4 = vcmp.eq.f32.partialorder %v3765_v62, 0.0 }
 0x238   :  { %v1679_v27 = vadd.f32 %v1667_v47, %v1655_v14 }
 0x239   :  { %v1754_v53 = vmul.f32 %v3760_v19, %v3760_v19  ;;  %v1696_v52 = vpop.permute.xlu0 %1695 }
 0x23a   :  { %v1698_v4 = vpop.permute.xlu1 %1697  ;;  %v1714_v36 = vsel %vm1600_vm1, %v1696_v52, 0.0 }
 0x23b   :  { %v1715_v12 = vsel %vm1600_vm1, %v1698_v4, 0.0  ;;  %v1726_v18 = vadd.f32 %v1714_v36, %v1678_v45  ;;  %v3771_v26 = vadd.f32 %v1758_v54, %v1754_v53 }
 0x23c   :  { %v1727_v25 = vadd.f32 %v1715_v12, %v1679_v27 }
 0x23d   :  { %v1550_v58 = vpop.permute.xlu0 %1549  ;;  %v1738_v39 = vmul.f32 0.125, %v1726_v18  ;;  %2888 = vrsqrt.f32 %v3771_v26  ;;  %vm1774_vm3 = vcmp.eq.f32.partialorder %v3771_v26, inf  ;;  %vm1776_vm5 = vcmp.eq.f32.partialorder %v3771_v26, 0.0 }
 0x23e   :  { %v1552_v32 = vpop.permute.xlu1 %1551  ;;  %v1739_v3 = vmul.f32 0.125, %v1727_v25  ;;  %v1569_v60 = vsel %vm1563_vm0, %v1550_v58, 0.0  ;;  %v1777_v53 = vand.u32 2147483648, %v3771_v26 }
 0x23f   :  { %v1749_v43 = vadd.f32 %v1738_v39, %v1734_v23  ;;  %v1570_v59 = vsel %vm1563_vm0, %v1552_v32, 0.0  ;;  %v1798_v10 = vmul.f32 %v1738_v39, %v1738_v39 }
 0x240   :  { %v1750_v5 = vadd.f32 %v1739_v3, %v1735_v42  ;;  %v1799_v0 = vmul.f32 %v1739_v3, %v1739_v3  ;;  %v2887_v44 = vpop.eup %2886 }
 0x241   :  { %v1587_v55 = vpop.permute.xlu0 %1586  ;;  %v1780_v34 = vmul.f32 %v2887_v44, %v3765_v62 }
 0x242   :  { %v1589_v63 = vpop.permute.xlu1 %1588  ;;  %v1606_v1 = vsel %vm1600_vm1, %v1587_v55, 0.0 }
 0x243   :  { %v1607_v8 = vsel %vm1600_vm1, %v1589_v63, 0.0  ;;  %v1618_v7 = vsub.f32 %v1569_v60, %v1606_v1  ;;  %v1782_v21 = vsel %vm1781_vm2, %v3765_v62, %v1780_v34 }
 0x244   :  { %v3783_v22 = vsub.f32 %v1570_v59, %v1607_v8  ;;  %v1785_v45 = vsel %vm1783_vm4, %v1784_v11, %v1782_v21 }
 0x245   :  { %v1794_v9 = vmul.f32 %v1618_v7, %v1618_v7  ;;  %v1644_v50 = vpop.permute.xlu0 %1643  ;;  %v1745_v27 = vadd.f32 %v1618_v7, %v3760_v19 }
 0x246   :  { %v1795_v51 = vmul.f32 %v3783_v22, %v3783_v22  ;;  %v1646_v20 = vpop.permute.xlu1 %1645  ;;  %v1658_v17 = vsel %vm1563_vm0, %v1644_v50, 0.0  ;;  %v1746_v8 = vadd.f32 %v3783_v22, %v3747_v49 }
 0x247   :  { %v1802_v48 = vadd.f32 %v1798_v10, %v1794_v9  ;;  %v1659_v29 = vsel %vm1563_vm0, %v1646_v20, 0.0  ;;  %v2889_v13 = vpop.eup %2888  ;;  %v1682_v38 = vadd.f32 %v1670_v16, %v1658_v17  ;;  %v3105_v16 = vmov 2.0  }
 0x248   :  { %v3787_v56 = vadd.f32 %v1799_v0, %v1795_v51  ;;  %v1683_v42 = vadd.f32 %v1671_v15, %v1659_v29  ;;  %v1773_v37 = vmul.f32 %v2889_v13, %v3771_v26 }
 0x249   :  { %2890 = vrsqrt.f32 %v1802_v48  ;;  %v1704_v31 = vpop.permute.xlu0 %1703  ;;  %vm1814_vm6 = vcmp.eq.f32.partialorder %v1802_v48, inf  ;;  %vm1816_vm7 = vcmp.eq.f32.partialorder %v1802_v48, 0.0  ;;  %v1817_v4 = vand.u32 2147483648, %v1802_v48 }
 0x24a   :  { %v1706_v6 = vpop.permute.xlu1 %1705  ;;  %2892 = vrsqrt.f32 %v3787_v56  ;;  %v1718_v24 = vsel %vm1600_vm1, %v1704_v31, 0.0  ;;  %v1775_v35 = vsel %vm1774_vm3, %v3771_v26, %v1773_v37  ;;  %vm1821_vm8 = vcmp.eq.f32.partialorder %v3787_v56, inf }
 0x24b   :  { %v1719_v40 = vsel %vm1600_vm1, %v1706_v6, 0.0  ;;  %v1730_v30 = vadd.f32 %v1718_v24, %v1682_v38  ;;  %vm1823_vm9 = vcmp.eq.f32.partialorder %v3787_v56, 0.0  ;;  %v1778_v36 = vsel %vm1776_vm5, %v1777_v53, %v1775_v35 }
 0x24c   :  { %v1731_v33 = vadd.f32 %v1719_v40, %v1683_v42  ;;  %v1824_v26 = vand.u32 2147483648, %v3787_v56  ;;  %v3106_v6 = vmov 3.0   ;;  %v3107_v38 = vmov 1.0  }
 0x24d   :  { %v1558_v23 = vpop.permute.xlu0 %1557  ;;  %v1742_v28 = vmul.f32 0.125, %v1730_v30 }
 0x24e   :  { %v1560_v61 = vpop.permute.xlu1 %1559  ;;  %v1743_v41 = vmul.f32 0.125, %v1731_v33  ;;  %v1573_v18 = vsel %vm1563_vm0, %v1558_v23, 0.0 }
 0x24f   :  { %v3806_v46 = vadd.f32 %v1749_v43, %v1742_v28  ;;  %v1574_v58 = vsel %vm1563_vm0, %v1560_v61, 0.0  ;;  %v1842_v43 = vmul.f32 %v1742_v28, %v1742_v28 }
 0x250   :  { %v3808_v14 = vadd.f32 %v1750_v5, %v1743_v41  ;;  %v1843_v20 = vmul.f32 %v1743_v41, %v1743_v41 }
 0x251   :  { %v1595_v47 = vpop.permute.xlu0 %1594  ;;  %vm1937_vm10 = vcmp.ge.f32.partialorder %v3806_v46, 0.0  ;;  %v1925_v29 = vand.u32 2147483647, %v3806_v46 }
 0x252   :  { %v1597_v54 = vpop.permute.xlu1 %1596  ;;  %v1610_v25 = vsel %vm1600_vm1, %v1595_v47, 0.0  ;;  %vm1938_vm11 = vcmp.ge.f32.partialorder %v3808_v14, 0.0  ;;  %v1943_v15 = vsel %vm1937_vm10, 6.0, %v3105_v16  ;;  %v1939_v31 = vsel %vm1937_vm10, 8.0, %v3727_v2 }
 0x253   :  { %v2891_v52 = vpop.eup %2890  ;;  %v1622_v32 = vsub.f32 %v1573_v18, %v1610_v25  ;;  %v1611_v5 = vsel %vm1600_vm1, %v1597_v54, 0.0  ;;  %v1945_v13 = vsel %vm1937_vm10, 5.0, %v3106_v6  ;;  %v1947_v42 = vsel %vm1937_vm10, 7.0, %v3107_v38 }
 0x254   :  { %v2893_v62 = vpop.eup %2892  ;;  %v1813_v12 = vmul.f32 %v2891_v52, %v1802_v48  ;;  %v1623_v10 = vsub.f32 %v1574_v58, %v1611_v5  ;;  %v1926_v33 = vand.u32 2147483647, %v3808_v14  ;;  %v1944_v61 = vsel %vm1938_vm11, 6.0, %v3105_v16 }
 0x255   :  { %v1820_v19 = vmul.f32 %v2893_v62, %v3787_v56  ;;  %v1896_v39 = vpop.permute.xlu0 %1895  ;;  %v1747_v59 = vadd.f32 %v1745_v27, %v1622_v32  ;;  %v1838_v1 = vmul.f32 %v1622_v32, %v1622_v32  ;;  %v1940_v28 = vsel %vm1938_vm11, 8.0, %v3727_v2 }
 0x256   :  { %v1815_v3 = vsel %vm1814_vm6, %v1802_v48, %v1813_v12  ;;  %v1900_v55 = vsel %vm1600_vm1, %v1896_v39, 0.0  ;;  %v1748_v48 = vadd.f32 %v1746_v8, %v1623_v10  ;;  %v1839_v17 = vmul.f32 %v1623_v10, %v1623_v10 }
 0x257   :  { %v1818_v63 = vsel %vm1816_vm7, %v1817_v4, %v1815_v3  ;;  %v1822_v60 = vsel %vm1821_vm8, %v3787_v56, %v1820_v19  ;;  %1905 = vst [vmem:[#allocation4 + $0x38] sm:$0xff] %v1900_v55  ;;  %v1846_v9 = vadd.f32 %v1842_v43, %v1838_v1  ;;  %v1923_v51 = vand.u32 2147483647, %v1747_v59 }
 0x258   :  { %v1825_v7 = vsel %vm1823_vm9, %v1824_v26, %v1822_v60  ;;  %v1834_v0 = vadd.f32 %v1818_v63, %v1778_v36  ;;  %vm1935_vm12 = vcmp.ge.f32.partialorder %v1747_v59, 0.0  ;;  %v1847_v56 = vadd.f32 %v1843_v20, %v1839_v17 }
 0x259   :  { %v3838_v50 = vadd.f32 %v1825_v7, %v1785_v45  ;;  %2894 = vrsqrt.f32 %v1846_v9  ;;  %v1927_v49 = vmul.f32 0.41421318, %v1923_v51  ;;  %v1931_v22 = vmul.f32 2.4142067, %v1923_v51 }
 0x25a   :  { %v1924_v44 = vand.u32 2147483647, %v1748_v48  ;;  %v1949_v34 = vsel %vm1935_vm12, %v1945_v13, %v1947_v42  ;;  %2896 = vrsqrt.f32 %v1847_v56  ;;  %v1941_v24 = vsel %vm1935_vm12, 4.0, %v1939_v31 }
 0x25b   :  { %vm1929_vm13 = vcmp.le.f32.partialorder %v1925_v29, %v1927_v49  ;;  %vm1933_vm14 = vcmp.gt.f32.partialorder %v1925_v29, %v1931_v22  ;;  %vm1936_vm15 = vcmp.ge.f32.partialorder %v1748_v48, 0.0  ;;  %v1946_v41 = vsel %vm1938_vm11, 5.0, %v3106_v6 }
 0x25c   :  { %v1951_v40 = vsel %vm1933_vm14, %v1943_v15, %v1949_v34  ;;  %v1928_v30 = vmul.f32 0.41421318, %v1924_v44  ;;  %v1932_v23 = vmul.f32 2.4142067, %v1924_v44  ;;  %v1948_v21 = vsel %vm1938_vm11, 7.0, %v3107_v38 }
 0x25d   :  { %v3855_v37 = vsel %vm1929_vm13, %v1941_v24, %v1951_v40  ;;  %v1950_v11 = vsel %vm1936_vm15, %v1946_v41, %v1948_v21  ;;  %v1942_v35 = vsel %vm1936_vm15, 4.0, %v1940_v28  ;;  %vm1858_vm4 = vcmp.eq.f32.partialorder %v1846_v9, inf }
 0x25e   :  { %vm1930_vm2 = vcmp.le.f32.partialorder %v1926_v33, %v1928_v30  ;;  %vm1934_vm3 = vcmp.gt.f32.partialorder %v1926_v33, %v1932_v23  ;;  %v1955_v46 = vmul.f32 45.0, %v3855_v37  ;;  %v1861_v4 = vand.u32 2147483648, %v1846_v9 }
 0x25f   :  { %v1952_v47 = vsel %vm1934_vm3, %v1944_v61, %v1950_v11  ;;  %vm1860_vm5 = vcmp.eq.f32.partialorder %v1846_v9, 0.0  ;;  %vm1865_vm6 = vcmp.eq.f32.partialorder %v1847_v56, inf  ;;  %v1868_v12 = vand.u32 2147483648, %v1847_v56 }
 0x260   :  { %v3867_v45 = vsel %vm1930_vm2, %v1942_v35, %v1952_v47  ;;  %2061 = vst [vmem:[#allocation12] sm:$0xff] %v1955_v46  ;;  %vm1867_vm7 = vcmp.eq.f32.partialorder %v1847_v56, 0.0 }
 0x261   :  { %v1956_v52 = vmul.f32 45.0, %v3867_v45 }
 0x263   :  { %v2895_v53 = vpop.eup %2894  ;;  %2062 = vst [vmem:[#allocation12 + $0x8] sm:$0xff] %v1956_v52 }
 0x264   :  { %v1857_v27 = vmul.f32 %v2895_v53, %v1846_v9  ;;  %v2897_v54 = vpop.eup %2896 }
 0x265   :  { %v1864_v14 = vmul.f32 %v2897_v54, %v1847_v56 }
 0x266   :  { %v1859_v62 = vsel %vm1858_vm4, %v1846_v9, %v1857_v27 }
 0x267   :  { %v1862_v36 = vsel %vm1860_vm5, %v1861_v4, %v1859_v62  ;;  %v1866_v25 = vsel %vm1865_vm6, %v1847_v56, %v1864_v14 }
 0x268   :  { %v3870_v18 = vadd.f32 %v1862_v36, %v1834_v0  ;;  %v1869_v19 = vsel %vm1867_vm7, %v1868_v12, %v1866_v25 }
 0x269   :  { %v3879_v26 = vadd.f32 %v1869_v19, %v3838_v50 }
 0x26a   :  { %1891 = vrot.lane.b32.xlu0 %v3870_v18, %s3104_s9  ;;  %1886 = vst [vmem:[#allocation4 + $0x8] sm:$0xff] %v3870_v18  ;;  %2059 = vst [vmem:[#allocation10] sm:$0xff] %v3870_v18  ;;  %1908 = vrot.lane.b32.xlu1 %v3870_v18, %s3103_s0 }
 0x26b   :  { %1887 = vst [vmem:[#allocation4 + $0x10] sm:$0xff] %v3879_v26  ;;  %2060 = vst [vmem:[#allocation10 + $0x8] sm:$0xff] %v3879_v26 }
 0x26c   :  { %3004 = shalt.err (!%p3001_p2)
}
 0x26d   :  { %s3005_s23 = scalar_lea.hbm %s4098_s2, 768 }
 0x26e   :  { %p3006_p3 = scmp.ne.s32.totalorder %s4098_s2, %s3005_s23  ;;  %p3009_p4 = scmp.lt.u32.totalorder %s3005_s23, %s4098_s2 }
 0x270   :  { %p3011_p6 = pnand %p3009_p4, %p3006_p3 }
 0x272   :  { %3014 = shalt.err (!%p3011_p6)
}
 0x273   :  { %2076 = dma.vmem_to_hbm [thread:$0]  %s2071_s19, 768, %s4098_s2, [#allocation8], %s3096_s28, %s3096_s28, %s3097_s29  }
 0x274   :  { %1910 = vrot.lane.b32.xlu0 %v3879_v26, %s3103_s0  ;;  %1893 = vrot.lane.b32.xlu1 %v3879_v26, %s3104_s9  ;;  %s3015_s7 = scalar_lea.vmem %s3881_s17, 256  ;;  %p3020_p8 = scmp.lt.s32.totalorder %s3881_s17, %s3881_s17 }
 0x275   :  { %p3016_p7 = scmp.ne.s32.totalorder %s3881_s17, %s3015_s7  ;;  %p3021_p9 = scmp.lt.s32.totalorder %s3015_s7, %s3015_s7 }
 0x277   :  { %p3022_p11 = por %p3021_p9, %p3020_p8 }
 0x279   :  { %p3023_p12 = pnand %p3022_p11, %p3016_p7 }
 0x27b   :  { %3026 = shalt.err (!%p3023_p12)
}
 0x27c   :  { %s3027_s11 = scalar_lea.hbm %s4099_s3, 256 }
 0x27d   :  { %p3028_p13 = scmp.ne.s32.totalorder %s4099_s3, %s3027_s11  ;;  %p3031_p5 = scmp.lt.u32.totalorder %s3027_s11, %s4099_s3 }
 0x27f   :  { %p3033_p0 = pnand %p3031_p5, %p3028_p13 }
 0x281   :  { %3036 = shalt.err (!%p3033_p0)
}
 0x282   :  { %2088 = dma.vmem_to_hbm [thread:$0]  %s3881_s17, 256, %s4099_s3, [#allocation11], %s3096_s28, %s3096_s28, %s3097_s29  }
 0x283   :  { %s3110_s12 = smov [#allocation12]   ;;  %1906 = vrot.lane.b32.xlu0 %v3727_v2, %s3103_s0  ;;  %1912 = vrot.lane.b32.xlu1 %v3727_v2, %s3103_s0 }
 0x284   :  { %s2094_s18 = sshll.u32 %s3110_s12, 4  ;;  %s2095_s18 = int_to_ptr.vmem [resolvable:$true] %s2094_s18 }
 0x285   :  { %s3037_s19 = scalar_lea.vmem %s2095_s18, 256  ;;  %p3042_p10 = scmp.lt.s32.totalorder %s2095_s18, %s2095_s18 }
 0x286   :  { %p3038_p1 = scmp.ne.s32.totalorder %s2095_s18, %s3037_s19  ;;  %p3043_p2 = scmp.lt.s32.totalorder %s3037_s19, %s3037_s19 }
 0x288   :  { %p3044_p3 = por %p3043_p2, %p3042_p10 }
 0x28a   :  { %p3045_p4 = pnand %p3044_p3, %p3038_p1 }
 0x28c   :  { %3048 = shalt.err (!%p3045_p4)
}
 0x28d   :  { %s3049_s3 = scalar_lea.hbm %s4100_s4, 256 }
 0x28e   :  { %p3050_p6 = scmp.ne.s32.totalorder %s4100_s4, %s3049_s3  ;;  %p3053_p7 = scmp.lt.u32.totalorder %s3049_s3, %s4100_s4 }
 0x290   :  { %p3055_p8 = pnand %p3053_p7, %p3050_p6 }
 0x292   :  { %3058 = shalt.err (!%p3055_p8)
}
 0x293   :  { %2100 = dma.vmem_to_hbm [thread:$0]  %s2095_s18, 256, %s4100_s4, [#allocation11], %s3096_s28, %s3096_s28, %s3097_s29   ;;  %v2151_v58 = vadd.f32 -4.0, %v3855_v37  ;;  %v1965_v32 = vadd.f32 4.0, %v3855_v37  ;;  %vm1957_vm8 = vcmp.eq.f32.partialorder %v3855_v37, 8.0  ;;  %vm1961_vm9 = vcmp.ge.f32.partialorder %v3855_v37, 4.0 }
 0x294   :  { %1889 = vrot.lane.b32.xlu1 %v3727_v2, %s3104_s9  ;;  %vm1958_vm10 = vcmp.eq.f32.partialorder %v3867_v45, 8.0  ;;  %v2152_v43 = vadd.f32 -4.0, %v3867_v45  ;;  %v1966_v5 = vadd.f32 4.0, %v3867_v45  ;;  %vm1962_vm11 = vcmp.ge.f32.partialorder %v3867_v45, 4.0  ;;  %v1989_v13 = vld [vmem:[#allocation4 + $0x9] sm:$0xff]  ;;  %v1990_v24 = vld [vmem:[#allocation4 + $0x11] sm:$0xff] }
 0x295   :  { %v3961_v63 = vsel %vm1957_vm8, 0.0, %v3855_v37  ;;  %v3963_v60 = vsel %vm1961_vm9, %v2151_v58, %v1965_v32  ;;  %v3966_v59 = vsel %vm1958_vm10, 0.0, %v3867_v45  ;;  %v2029_v4 = vld [vmem:[#allocation4 + $0x7] sm:$0xff]  ;;  %v2030_v54 = vld [vmem:[#allocation4 + $0xf] sm:$0xff]  ;;  %s3111_s4 = smov [#allocation13]  }
 0x296   :  { %v3968_v7 = vsel %vm1962_vm11, %v2152_v43, %v1966_v5  ;;  %vm1971_vm12 = vcmp.eq.f32.partialorder %v3961_v63, 0.0  ;;  %vm1975_vm13 = vcmp.eq.f32.partialorder %v3963_v60, 0.0  ;;  %vm1981_vm14 = vcmp.eq.f32.partialorder %v3961_v63, 1.0  ;;  %s2106_s9 = sshll.u32 %s3111_s4, 4  ;;  %s2107_s9 = int_to_ptr.vmem [resolvable:$true] %s2106_s9 }
 0x297   :  { %vm1972_vm15 = vcmp.eq.f32.partialorder %v3966_v59, 0.0  ;;  %vm1976_vm5 = vcmp.eq.f32.partialorder %v3968_v7, 0.0  ;;  %vm1982_vm6 = vcmp.eq.f32.partialorder %v3966_v59, 1.0  ;;  %vm2001_vm10 = vcmp.eq.f32.partialorder %v3961_v63, 3.0  ;;  %s3059_s26 = scalar_lea.vmem %s2107_s9, 256  ;;  %p3064_p11 = scmp.lt.s32.totalorder %s2107_s9, %s2107_s9 }
 0x298   :  { %vm2011_vm8 = vcmp.eq.f32.partialorder %v3961_v63, 4.0  ;;  %vm2012_vm7 = vcmp.eq.f32.partialorder %v3966_v59, 4.0  ;;  %vm2015_vm2 = vcmp.eq.f32.partialorder %v3963_v60, 4.0  ;;  %vm2021_vm9 = vcmp.eq.f32.partialorder %v3961_v63, 5.0  ;;  %p3060_p9 = scmp.ne.s32.totalorder %s2107_s9, %s3059_s26  ;;  %p3065_p12 = scmp.lt.s32.totalorder %s3059_s26, %s3059_s26 }
 0x299   :  { %vm2022_vm11 = vcmp.eq.f32.partialorder %v3966_v59, 5.0  ;;  %vm2025_vm4 = vcmp.eq.f32.partialorder %v3963_v60, 5.0  ;;  %vm2026_vm3 = vcmp.eq.f32.partialorder %v3968_v7, 5.0 }
 0x29a   :  { %p3066_p13 = por %p3065_p12, %p3064_p11 }
 0x29c   :  { %p3067_p5 = pnand %p3066_p13, %p3060_p9 }
 0x2dc   :  { %v1892_v39 = vpop.permute.xlu0 %1891  ;;  %v1909_v3 = vpop.permute.xlu1 %1908 }
 0x2dd   :  { %v1898_v55 = vsel %vm1600_vm1, %v1892_v39, 0.0  ;;  %v3956_v2 = vsel %vm1563_vm0, %v1909_v3, 0.0 }
 0x2de   :  { %1903 = vst [vmem:[#allocation4 + $0x28] sm:$0xff] %v1898_v55  ;;  %1920 = vst [vmem:[#allocation4 + $0x48] sm:$0xff] %v3956_v2  ;;  %v1973_v17 = vsel %vm1971_vm12, %v1898_v55, 0.0  ;;  %v1977_v22 = vsel %vm1975_vm13, %v1898_v55, 0.0  ;;  %vm4142_vm12 = vcmp.eq.f32.partialorder %v3968_v7, 1.0  ;;  %vm4143_vm13 = vcmp.eq.f32.partialorder %v3961_v63, 2.0 }
 0x2e6   :  { %v1911_v1 = vpop.permute.xlu0 %1910  ;;  %v1894_v8 = vpop.permute.xlu1 %1893 }
 0x2e7   :  { %v3972_v10 = vsel %vm1563_vm0, %v1911_v1, 0.0  ;;  %v1899_v0 = vsel %vm1600_vm1, %v1894_v8, 0.0 }
 0x2e8   :  { %1921 = vst [vmem:[#allocation4 + $0x50] sm:$0xff] %v3972_v10  ;;  %1904 = vst [vmem:[#allocation4 + $0x30] sm:$0xff] %v1899_v0  ;;  %v1974_v49 = vsel %vm1972_vm15, %v1899_v0, 0.0  ;;  %v1978_v56 = vsel %vm1976_vm5, %v1899_v0, 0.0  ;;  %vm4144_vm15 = vcmp.eq.f32.partialorder %v3963_v60, 2.0  ;;  %vm2031_vm5 = vcmp.eq.f32.partialorder %v3961_v63, 6.0 }
 0x2ef   :  { %v1979_v44 = vld [vmem:[#allocation4 + $0x29] sm:$0xff]  ;;  %v1980_v16 = vld [vmem:[#allocation4 + $0x31] sm:$0xff] }
 0x2f0   :  { %v1983_v15 = vsel %vm1981_vm14, %v1979_v44, %v1973_v17  ;;  %v1984_v31 = vsel %vm1982_vm6, %v1980_v16, %v1974_v49  ;;  %v1988_v6 = vsel %vm4142_vm12, %v1980_v16, %v1978_v56  ;;  %v1999_v34 = vld [vmem:[#allocation4 + $0x49] sm:$0xff]  ;;  %vm2032_vm14 = vcmp.eq.f32.partialorder %v3966_v59, 6.0 }
 0x2f1   :  { %v1993_v38 = vsel %vm4143_vm13, %v1989_v13, %v1983_v15  ;;  %vm4145_vm6 = vcmp.eq.f32.partialorder %v3963_v60, 3.0  ;;  %vm2036_vm12 = vcmp.eq.f32.partialorder %v3968_v7, 6.0  ;;  %vm4146_vm13 = vcmp.eq.f32.partialorder %v3966_v59, 2.0  ;;  %v2020_v53 = vld [vmem:[#allocation4 + $0x4f] sm:$0xff] }
 0x2f2   :  { %v2003_v40 = vsel %vm2001_vm10, %v1999_v34, %v1993_v38  ;;  %v1994_v33 = vsel %vm4146_vm13, %v1990_v24, %v1984_v31  ;;  %vm4148_vm10 = vcmp.eq.f32.partialorder %v3966_v59, 3.0  ;;  %v2040_v19 = vld [vmem:[#allocation4 + $0x2f] sm:$0xff] }
 0x2f3   :  { %v2013_v61 = vsel %vm2011_vm8, %v3956_v2, %v2003_v40  ;;  %vm2042_vm8 = vcmp.eq.f32.partialorder %v3966_v59, 7.0 }
 0x2f5   :  { %v1907_v9 = vpop.permute.xlu0 %1906  ;;  %v1913_v51 = vpop.permute.xlu1 %1912 }
 0x2f6   :  { %v1914_v50 = vsel %vm1563_vm0, %v1907_v9, 0.0  ;;  %v1917_v20 = vsel %vm1563_vm0, %v1913_v51, 0.0  ;;  %vm2016_vm0 = vcmp.eq.f32.partialorder %v3968_v7, 4.0 }
 0x2f7   :  { %1919 = vst [vmem:[#allocation4 + $0x40] sm:$0xff] %v1914_v50  ;;  %1922 = vst [vmem:[#allocation4 + $0x58] sm:$0xff] %v1917_v20 }
 0x2fe   :  { %v2000_v23 = vld [vmem:[#allocation4 + $0x51] sm:$0xff]  ;;  %v2019_v41 = vld [vmem:[#allocation4 + $0x47] sm:$0xff] }
 0x2ff   :  { %v2004_v21 = vsel %vm4148_vm10, %v2000_v23, %v1994_v33  ;;  %v2023_v46 = vsel %vm2021_vm9, %v2019_v41, %v2013_v61 }
 0x300   :  { %v2014_v47 = vsel %vm2012_vm7, %v3972_v10, %v2004_v21  ;;  %vm2046_vm7 = vcmp.eq.f32.partialorder %v3968_v7, 7.0  ;;  %v2033_v62 = vsel %vm2031_vm5, %v2029_v4, %v2023_v46 }
 0x301   :  { %v2024_v27 = vsel %vm2022_vm11, %v2020_v53, %v2014_v47 }
 0x302   :  { %v2034_v14 = vsel %vm2032_vm14, %v2030_v54, %v2024_v27 }
 0x303   :  { %v2044_v32 = vsel %vm2042_vm8, %v2040_v19, %v2034_v14 }
 0x304   :  { %v2050_v5 = vsub.f32 %v3879_v26, %v2044_v32 }
 0x306   :  { %v1890_v48 = vpop.permute.xlu1 %1889 }
 0x307   :  { %v1897_v29 = vsel %vm1600_vm1, %v1890_v48, 0.0  ;;  %vm4141_vm1 = vcmp.eq.f32.partialorder %v3963_v60, 1.0 }
 0x308   :  { %1902 = vst [vmem:[#allocation4 + $0x20] sm:$0xff] %v1897_v29  ;;  %v1987_v57 = vsel %vm4141_vm1, %v1979_v44, %v1977_v22  ;;  %vm2035_vm1 = vcmp.eq.f32.partialorder %v3963_v60, 6.0 }
 0x309   :  { %v1997_v42 = vsel %vm4144_vm15, %v1989_v13, %v1987_v57  ;;  %vm4147_vm15 = vcmp.eq.f32.partialorder %v3968_v7, 2.0 }
 0x30a   :  { %v2007_v30 = vsel %vm4145_vm6, %v1999_v34, %v1997_v42  ;;  %v1998_v37 = vsel %vm4147_vm15, %v1990_v24, %v1988_v6  ;;  %vm4149_vm6 = vcmp.eq.f32.partialorder %v3968_v7, 3.0 }
 0x30b   :  { %v2017_v28 = vsel %vm2015_vm2, %v3956_v2, %v2007_v30  ;;  %v2008_v11 = vsel %vm4149_vm6, %v2000_v23, %v1998_v37  ;;  %vm2041_vm2 = vcmp.eq.f32.partialorder %v3961_v63, 7.0 }
 0x30c   :  { %v2027_v35 = vsel %vm2025_vm4, %v2019_v41, %v2017_v28  ;;  %v2018_v45 = vsel %vm2016_vm0, %v3972_v10, %v2008_v11  ;;  %vm2045_vm4 = vcmp.eq.f32.partialorder %v3963_v60, 7.0 }
 0x30d   :  { %v2028_v52 = vsel %vm2026_vm3, %v2020_v53, %v2018_v45  ;;  %v2037_v36 = vsel %vm2035_vm1, %v2029_v4, %v2027_v35 }
 0x30e   :  { %v2038_v12 = vsel %vm2036_vm12, %v2030_v54, %v2028_v52 }
 0x30f   :  { %v2039_v25 = vld [vmem:[#allocation4 + $0x27] sm:$0xff]  ;;  %v2048_v3 = vsel %vm2046_vm7, %v2040_v19, %v2038_v12 }
 0x310   :  { %v2043_v58 = vsel %vm2041_vm2, %v2039_v25, %v2033_v62  ;;  %v2047_v39 = vsel %vm2045_vm4, %v2039_v25, %v2037_v36  ;;  %v2052_v2 = vsub.f32 %v3879_v26, %v2048_v3 }
 0x311   :  { %v2049_v43 = vsub.f32 %v3870_v18, %v2043_v58  ;;  %v2051_v55 = vsub.f32 %v3870_v18, %v2047_v39 }
 0x312   :  { %v2054_v60 = vmin.f32 %v2050_v5, %v2052_v2 }
 0x313   :  { %v2053_v63 = vmin.f32 %v2049_v43, %v2051_v55 }
 0x314   :  { %vm2056_vm9 = vcmp.gt.f32.partialorder %v2054_v60, 0.0 }
 0x315   :  { %vm2055_vm3 = vcmp.gt.f32.partialorder %v2053_v63, 0.0  ;;  %v2058_v1 = vsel %vm2056_vm9, %v3879_v26, 0.0 }
 0x316   :  { %v2057_v59 = vsel %vm2055_vm3, %v3870_v18, 0.0  ;;  %2064 = vst [vmem:[#allocation13 + $0x8] sm:$0xff] %v2058_v1 }
 0x317   :  { %2063 = vst [vmem:[#allocation13] sm:$0xff] %v2057_v59 }
 0x318   :  { %3070 = shalt.err (!%p3067_p5)
}
 0x319   :  { %s3071_s6 = scalar_lea.hbm %s4101_s5, 256 }
 0x31a   :  { %p3072_p0 = scmp.ne.s32.totalorder %s4101_s5, %s3071_s6  ;;  %p3075_p1 = scmp.lt.u32.totalorder %s3071_s6, %s4101_s5 }
 0x31c   :  { %p3077_p10 = pnand %p3075_p1, %p3072_p0 }
 0x31e   :  { %3080 = shalt.err (!%p3077_p10)
}
 0x31f   :  { %2112 = dma.vmem_to_hbm [thread:$0]  %s2107_s9, 256, %s4101_s5, [#allocation14], %s3096_s28, %s3096_s28, %s3097_s29  }
 0x320   :  { %3089 = dma.done.wait [#allocation8], 768  }
 0x321   :  { %3090 = vsyncadd [#allocation8], 4294966528 }
 0x322   :  { %3091 = dma.done.wait [#allocation11], 512  }
 0x323   :  { %3092 = vsyncadd [#allocation11], 4294966784 }
 0x324   :  { %3093 = dma.done.wait [#allocation14], 256  }
 0x325   :  { %3094 = vsyncadd [#allocation14], 4294967040 }
 0x326   :  { %2125 = vsyncpa [#allocation7], 1 }
 0x327   :  { %2126 = vsyncpa [#allocation8], 1 }
 0x328   :  { %2127 = vsyncpa [#allocation11], 1 }
 0x329   :  { %2128 = vsyncpa [#allocation14], 1 }
 0x32a   :  { %2129 = vsyncmov [#allocation5] }
 0x32d   :  { %s2130_s13 = vpop.sfrf %2129 }
 0x32e   :  { %p2153_p2 = scmp.ne.s32.totalorder %s2130_s13, 0 }
 0x330   :  { %2134 = shalt.err (%p2153_p2)  }
 0x331   :  { %2136 = vsyncmov [#allocation5 + $0x1] }
 0x334   :  { %s2137_s14 = vpop.sfrf %2136 }
 0x335   :  { %p2154_p3 = scmp.ne.s32.totalorder %s2137_s14, 0 }
 0x337   :  { %2141 = shalt.err (%p2154_p3)  }
 0x338   :  { %2143 = vsyncmov [#allocation5 + $0x2] }
 0x33b   :  { %s2144_s5 = vpop.sfrf %2143 }
 0x33c   :  { %p2155_p4 = scmp.ne.s32.totalorder %s2144_s5, 0 }
 0x33e   :  { %2148 = shalt.err (%p2155_p4)  }

</bundles_post_ra>
